<compile_context>
chip_gen: v5e
topology: v5e:2x2
jax: 0.10.0
libtpu: 0.0.40
codegen_flags: <defaults>
</compile_context>

<pallas_src>
import functools
import math

import jax
import jax.numpy as jnp
import numpy as np
from jax import lax
from jax.experimental import pallas as pl
from jax.experimental.pallas import tpu as pltpu


# ----------------------------- Pallas kernels ------------------------------

def _blur_crop_kernel(x_ref, o_ref, *, w1d, off):
    """Separable Gaussian blur with the [bi:-bi, bi:-bi] crop folded in.

    out[j, i] = sum_dy sum_dx g[dy] g[dx] * x[j + off + dy, i + off + dx]
    computed as a vertical pass then a horizontal pass (14 FMAs/output)."""
    nt, h, w = o_ref.shape
    W = x_ref.shape[2]
    x = x_ref[...]
    tmp = jnp.zeros((nt, h, W), jnp.float32)
    for dy, wy in enumerate(w1d):                       # 7 sublane-shifted FMAs
        tmp = tmp + wy * x[:, off + dy: off + dy + h, :]
    out = jnp.zeros((nt, h, w), jnp.float32)
    for dx, wx in enumerate(w1d):                       # 7 lane-shifted FMAs
        out = out + wx * tmp[:, :, off + dx: off + dx + w]
    o_ref[...] = out


def _color_stats_kernel(qr_ref, gh_ref, *, C):
    """Single MXU pass for the per-batch normal equations:
         [G | H] = q @ [q ; r]^T   with  G = q q^T,  H = q r^T."""
    q = qr_ref[0, :C, :]                                # (C, P)
    qr = qr_ref[0]                                      # (2C, P)
    gh_ref[0] = lax.dot_general(q, qr, (((1,), (1,)), ((), ())),
                                preferred_element_type=jnp.float32)


def _color_err_kernel(qr_ref, c_ref, err_ref, *, C):
    """err[p] = || (c^T q - r)[:, p] * 255 ||_2 over channels.
    The 3x3 matrix lives in SMEM; contraction = 9 broadcast FMAs on the VPU."""
    b = pl.program_id(0)
    P = qr_ref.shape[2]
    acc = jnp.zeros((P,), jnp.float32)
    for c in range(C):
        conv = jnp.zeros((P,), jnp.float32)
        for k in range(C):
            conv = conv + c_ref[b, k, c] * qr_ref[0, k, :]
        d = (conv - qr_ref[0, C + c, :]) * 255.0
        acc = acc + d * d
    err_ref[0, 0, :] = jnp.sqrt(acc)


def _apply_color_kernel(x_ref, c_ref, o_ref, *, C):
    """out[c, :] = sum_k c[k, c] * x[k, :] — 9 VPU FMAs per lane tile, colour
    matrix read as scalars from SMEM so the kernel stays purely DMA-bound."""
    b = pl.program_id(0)
    for c in range(C):
        acc = c_ref[b, 0, c] * x_ref[0, 0, :]
        for k in range(1, C):
            acc = acc + c_ref[b, k, c] * x_ref[0, k, :]
        o_ref[0, c, :] = acc


# --------------------------- Pallas call wrappers ---------------------------

def _pick_blur_tile(N, H, W, h, w, budget=8 * 1024 * 1024):
    """Largest divisor of N whose block (input + intermediate + output, f32,
    double-buffered) stays under `budget` bytes (safe w.r.t. v7x's 64 MiB
    VMEM), while keeping >= 2 grid steps so v7x's two TensorCores share work."""
    per_n = 4 * (H * W + h * W + h * w) * 2
    nt = max(1, min(N, budget // max(per_n, 1)))
    if N >= 2:
        nt = min(nt, max(1, N // 2))
    while N % nt:
        nt -= 1
    return nt


def _pick_p_tile(P, C, budget=8 * 1024 * 1024):
    """Largest pixel tile (multiple of 128 or the full P) under `budget`."""
    per_p = C * 4 * 2 * 2                               # in + out, 2x buffers, f32
    cap = max(1, budget // per_p)
    if P <= cap:
        return P
    t = (cap // 128) * 128
    while t >= 128 and P % t:
        t -= 128
    return t if (t >= 128 and P % t == 0) else P


def gauss_blur_crop(x, w1d, ksz, bi):
    """apply_kernel() + [bi:-bi, bi:-bi] crop, fused.  Valid because
    bi >= ksz//2, so the reflect-padded border never reaches the kept region
    and we can read straight from the un-padded image."""
    N, H, W = x.shape
    pad = ksz // 2
    assert bi >= pad
    h, w = H - 2 * bi, W - 2 * bi
    nt = _pick_blur_tile(N, H, W, h, w)
    # TODO(synk): for multi-megapixel inputs also tile the row axis so blocks
    # stay within v7x's 64 MiB VMEM.
    kern = functools.partial(_blur_crop_kernel,
                             w1d=tuple(float(v) for v in w1d), off=bi - pad)
    return pl.pallas_call(
        kern,
        grid=(N // nt,),
        in_specs=[pl.BlockSpec((nt, H, W), lambda i: (i, 0, 0))],
        out_specs=pl.BlockSpec((nt, h, w), lambda i: (i, 0, 0)),
        out_shape=jax.ShapeDtypeStruct((N, h, w), jnp.float32),
        compiler_params=pltpu.CompilerParams(dimension_semantics=("parallel",)),
    )(x)


def color_stats(qr, C):
    """qr: (B, 2C, P) with rows [q; r].  Returns G = q q^T, H = q r^T."""
    B, C2, P = qr.shape
    gh = pl.pallas_call(
        functools.partial(_color_stats_kernel, C=C),
        grid=(B,),
        in_specs=[pl.BlockSpec((1, C2, P), lambda b: (b, 0, 0))],
        out_specs=pl.BlockSpec((1, C, C2), lambda b: (b, 0, 0)),
        out_shape=jax.ShapeDtypeStruct((B, C, C2), jnp.float32),
        compiler_params=pltpu.CompilerParams(dimension_semantics=("parallel",)),
    )(qr)
    return gh[:, :, :C], gh[:, :, C:]


def color_err(qr, c_mat, C):
    B, C2, P = qr.shape
    err = pl.pallas_call(
        functools.partial(_color_err_kernel, C=C),
        grid=(B,),
        in_specs=[pl.BlockSpec((1, C2, P), lambda b: (b, 0, 0)),
                  pl.BlockSpec(memory_space=pltpu.MemorySpace.SMEM)],
        out_specs=pl.BlockSpec((1, 1, P), lambda b: (b, 0, 0)),
        out_shape=jax.ShapeDtypeStruct((B, 1, P), jnp.float32),
        compiler_params=pltpu.CompilerParams(dimension_semantics=("parallel",)),
    )(qr, c_mat)
    return err[:, 0]


def apply_color(x, c_mat):
    """x: (B, C, P).  Returns c_mat^T applied to every pixel
    (== torch.matmul(x^T, c_mat)^T)."""
    B, C, P = x.shape
    tile = _pick_p_tile(P, C)
    return pl.pallas_call(
        functools.partial(_apply_color_kernel, C=C),
        grid=(B, P // tile),
        in_specs=[pl.BlockSpec((1, C, tile), lambda b, p: (b, 0, p)),
                  pl.BlockSpec(memory_space=pltpu.MemorySpace.SMEM)],
        out_specs=pl.BlockSpec((1, C, tile), lambda b, p: (b, 0, p)),
        out_shape=jax.ShapeDtypeStruct((B, C, P), jnp.float32),
        compiler_params=pltpu.CompilerParams(
            dimension_semantics=("parallel", "parallel")),
    )(x, c_mat)


# ------------------------------ Plain-JAX glue ------------------------------
# TODO(synk): bilinear grid_sample (warp) and F.interpolate are data-dependent
# scattered gathers with no clean Pallas TPU equivalent; kept in plain JAX.

def interpolate_bilinear_nchw(x, out_h, out_w):
    """F.interpolate(mode='bilinear', align_corners=False), no antialias."""
    B, C, H, W = x.shape
    sh, sw = H / out_h, W / out_w
    ys = jnp.maximum((jnp.arange(out_h, dtype=jnp.float32) + 0.5) * sh - 0.5, 0.0)
    xs = jnp.maximum((jnp.arange(out_w, dtype=jnp.float32) + 0.5) * sw - 0.5, 0.0)
    y0 = jnp.floor(ys).astype(jnp.int32)
    x0 = jnp.floor(xs).astype(jnp.int32)
    wy = (ys - y0.astype(jnp.float32))[None, None, :, None]
    wx = (xs - x0.astype(jnp.float32))[None, None, None, :]
    y1 = jnp.minimum(y0 + 1, H - 1)
    x1 = jnp.minimum(x0 + 1, W - 1)
    top = x[:, :, y0, :]
    bot = x[:, :, y1, :]
    rows = top * (1.0 - wy) + bot * wy
    left = rows[:, :, :, x0]
    right = rows[:, :, :, x1]
    return left * (1.0 - wx) + right * wx


def _grid_sample_bilinear_zeros(feat, grid_norm):
    """F.grid_sample(mode='bilinear', padding_mode='zeros', align_corners=True)."""
    B, C, H, W = feat.shape
    gx, gy = grid_norm[..., 0], grid_norm[..., 1]
    x = (gx + 1.0) * 0.5 * (W - 1)
    y = (gy + 1.0) * 0.5 * (H - 1)
    x0f = jnp.floor(x)
    y0f = jnp.floor(y)
    wx1 = (x - x0f).reshape(B, 1, -1)
    wy1 = (y - y0f).reshape(B, 1, -1)
    featf = feat.reshape(B, C, H * W)

    def sample(xi, yi):
        inb = ((xi >= 0) & (xi <= W - 1) & (yi >= 0) & (yi <= H - 1))
        xc = jnp.clip(xi, 0, W - 1).astype(jnp.int32)
        yc = jnp.clip(yi, 0, H - 1).astype(jnp.int32)
        idx = (yc * W + xc).reshape(B, 1, -1)
        g = jnp.take_along_axis(featf, jnp.broadcast_to(idx, (B, C, H * W)), axis=2)
        return g * inb.reshape(B, 1, -1).astype(feat.dtype)

    v00 = sample(x0f, y0f)
    v01 = sample(x0f + 1.0, y0f)
    v10 = sample(x0f, y0f + 1.0)
    v11 = sample(x0f + 1.0, y0f + 1.0)
    out = (v00 * (1 - wx1) * (1 - wy1) + v01 * wx1 * (1 - wy1)
           + v10 * (1 - wx1) * wy1 + v11 * wx1 * wy1)
    return out.reshape(B, C, H, W)


def warp(feat, flow):
    # Matches the reference exactly: grid built with +0.5 pixel centres and
    # normalised by W/H, then denormalised with align_corners=True ((W-1)/(H-1)).
    B, C, H, W = feat.shape
    rowv, colv = jnp.meshgrid(jnp.arange(H, dtype=jnp.float32) + 0.5,
                              jnp.arange(W, dtype=jnp.float32) + 0.5,
                              indexing='ij')
    grid = jnp.stack((colv, rowv), axis=0)[None]           # (1, 2, H, W)
    grid = grid + flow
    gnc = 2.0 * grid[:, 0] / W - 1.0
    gnr = 2.0 * grid[:, 1] / H - 1.0
    grid_norm = jnp.stack((gnc, gnr), axis=-1)              # (B, H, W, 2)
    return _grid_sample_bilinear_zeros(feat, grid_norm)


def _get_gaussian_1d_np(sd=1.5):
    """1-D taps g such that outer(g, g) equals the reference's normalised
    2-D Gaussian kernel exactly (separable blur)."""
    ksz = int(4 * sd + 1)
    assert ksz % 2 == 1
    k = np.arange(-(ksz - 1) / 2, (ksz + 1) / 2)
    g = np.exp(-1.0 / (2 * sd ** 2) * k ** 2) / (math.sqrt(2 * math.pi) * sd)
    g = g / g.sum()
    return g, ksz


class SimpleAlignmentNet:
    """Deterministic stand-in for the external alignment_net:
    1x1 conv on concat(pred, gt) producing a small 2-channel flow."""
    def __init__(self, key):
        self.w = 0.5 * jax.random.normal(key, (2, 6), jnp.float32)

    def __call__(self, a, b):
        x = jnp.concatenate([a, b], axis=1)
        f = jnp.einsum('oc,bchw->bohw', self.w, x)
        return 2.0 * jnp.tanh(f)


class SpatialColorAlignment:
    def __init__(self, alignment_net, sr_factor=4):
        self.sr_factor = sr_factor
        self.alignment_net = alignment_net
        self.gauss_1d, self.ksz = _get_gaussian_1d_np(sd=1.5)

    def match_colors(self, im_ref, im_q, im_test):
        bi = 5
        B, C, H, W = im_ref.shape
        # One fused blur+crop pallas_call for both images: channels 0..C-1 of
        # `stacked` are im_q, C..2C-1 are im_ref.
        stacked = jnp.concatenate([im_q, im_ref], axis=1).reshape(B * 2 * C, H, W)
        blurred = gauss_blur_crop(stacked, self.gauss_1d, self.ksz, bi)
        h, w = blurred.shape[-2:]
        qr = blurred.reshape(B, 2 * C, h * w)
        # torch.lstsq -> normal equations (Pallas, one MXU pass) + ridge-
        # stabilised batched 3x3 solve in JAX (guards singular G in flat regions).
        G, Hn = color_stats(qr, C)
        ridge = (1e-6 / C) * jnp.trace(G, axis1=1, axis2=2)[:, None, None]
        c_mat = jnp.linalg.solve(G + ridge * jnp.eye(C, dtype=G.dtype), Hn)
        err = color_err(qr, c_mat, C).reshape(B, h, w)
        valid = err < 20.0
        pad = (im_q.shape[-1] - valid.shape[-1]) // 2
        valid = jnp.pad(valid, ((0, 0), (pad, pad), (pad, pad)))
        up = im_test.shape[-1] / valid.shape[-1]
        validf = interpolate_bilinear_nchw(
            valid[:, None].astype(jnp.float32),
            int(valid.shape[-2] * up), int(valid.shape[-1] * up))
        valid = validf > 0.9
        im_test_re = im_test.reshape(B, C, -1)
        im_t_conv = apply_color(im_test_re, c_mat).reshape(im_test.shape)
        return im_t_conv, valid

    def __call__(self, pred, gt, burst_input):
        flow = jax.lax.stop_gradient(
            self.alignment_net(pred / (jnp.max(pred) + 1e-6),
                               gt / (jnp.max(gt) + 1e-6)))
        pred_warped = warp(pred, flow)
        ds = 1.0 / (2.0 * self.sr_factor)
        B, _, H, W = flow.shape
        flow_ds = interpolate_bilinear_nchw(flow, int(H * ds), int(W * ds)) * ds
        burst_0 = burst_input[:, 0][:, jnp.array([0, 1, 3])]
        burst_0_warped = warp(burst_0, flow_ds)
        frame_gt_ds = interpolate_bilinear_nchw(
            gt, int(gt.shape[-2] * ds), int(gt.shape[-1] * ds))
        return self.match_colors(frame_gt_ds, burst_0_warped, pred_warped)


# ----------------------------------- main -----------------------------------

if __name__ == "__main__":
    key = jax.random.PRNGKey(0)
    k_align, k_pred, k_gt, k_burst = jax.random.split(key, 4)

    B, H, W, sr = 2, 128, 128, 4
    ds = 2 * sr                                  # burst / downsample factor = 8

    align_net = SimpleAlignmentNet(k_align)
    sca = SpatialColorAlignment(align_net, sr_factor=sr)

    pred = jax.random.uniform(k_pred, (B, 3, H, W), jnp.float32)
    gt = jax.random.uniform(k_gt, (B, 3, H, W), jnp.float32)
    burst_input = jax.random.uniform(k_burst, (B, 4, 4, H // ds, W // ds),
                                     jnp.float32)

    fwd = jax.jit(lambda p, g, bi: sca(p, g, bi))
    pred_warped_m, valid = fwd(pred, gt, burst_input)
    jax.block_until_ready((pred_warped_m, valid))

    assert pred_warped_m.shape == (B, 3, H, W) and pred_warped_m.dtype == jnp.float32
    assert valid.shape == (B, 1, H, W) and valid.dtype == jnp.bool_
    print("KERNEL_OK")
</pallas_src>

<mosaic_0001>
module attributes {stable_mosaic.version = 11 : i64} {
  func.func @_blur_crop_kernel(%arg0: i32, %arg1: memref<6x16x16xf32, #tpu.memory_space<vmem>>, %arg2: memref<6x6x6xf32, #tpu.memory_space<vmem>>) attributes {dimension_semantics = [#tpu.dimension_semantics<parallel>], iteration_bounds = array<i64: 2>, scalar_prefetch = 0 : i64, scratch_operands = 0 : i64, tpu.core_type = #tpu.core_type<tc>, window_params = [{transform_indices = @transform_0, window_bounds = array<i64: 6, 16, 16>}, {transform_indices = @transform_1, window_bounds = array<i64: 6, 6, 6>}]} {
    %c0 = arith.constant 0 : index
    %c0_0 = arith.constant 0 : index
    %c0_1 = arith.constant 0 : index
    %0 = vector.load %arg1[%c0, %c0_0, %c0_1] : memref<6x16x16xf32, #tpu.memory_space<vmem>>, vector<6x16x16xf32>
    %cst = arith.constant 0.000000e+00 : f32
    %1 = vector.broadcast %cst : f32 to vector<6x6x16xf32>
    %2 = vector.extract_strided_slice %0 {offsets = [0, 2, 0], sizes = [6, 6, 16], strides = [1, 1, 1]} : vector<6x16x16xf32> to vector<6x6x16xf32>
    %cst_2 = arith.constant 0.036632847 : f32
    %3 = vector.broadcast %cst_2 : f32 to vector<6x6x16xf32>
    %4 = arith.mulf %3, %2 : vector<6x6x16xf32>
    %5 = arith.addf %1, %4 : vector<6x6x16xf32>
    %6 = vector.extract_strided_slice %0 {offsets = [0, 3, 0], sizes = [6, 6, 16], strides = [1, 1, 1]} : vector<6x16x16xf32> to vector<6x6x16xf32>
    %cst_3 = arith.constant 0.111280762 : f32
    %7 = vector.broadcast %cst_3 : f32 to vector<6x6x16xf32>
    %8 = arith.mulf %7, %6 : vector<6x6x16xf32>
    %9 = arith.addf %5, %8 : vector<6x6x16xf32>
    %10 = vector.extract_strided_slice %0 {offsets = [0, 4, 0], sizes = [6, 6, 16], strides = [1, 1, 1]} : vector<6x16x16xf32> to vector<6x6x16xf32>
    %cst_4 = arith.constant 0.216745317 : f32
    %11 = vector.broadcast %cst_4 : f32 to vector<6x6x16xf32>
    %12 = arith.mulf %11, %10 : vector<6x6x16xf32>
    %13 = arith.addf %9, %12 : vector<6x6x16xf32>
    %14 = vector.extract_strided_slice %0 {offsets = [0, 5, 0], sizes = [6, 6, 16], strides = [1, 1, 1]} : vector<6x16x16xf32> to vector<6x6x16xf32>
    %cst_5 = arith.constant 0.270682156 : f32
    %15 = vector.broadcast %cst_5 : f32 to vector<6x6x16xf32>
    %16 = arith.mulf %15, %14 : vector<6x6x16xf32>
    %17 = arith.addf %13, %16 : vector<6x6x16xf32>
    %18 = vector.extract_strided_slice %0 {offsets = [0, 6, 0], sizes = [6, 6, 16], strides = [1, 1, 1]} : vector<6x16x16xf32> to vector<6x6x16xf32>
    %cst_6 = arith.constant 0.216745317 : f32
    %19 = vector.broadcast %cst_6 : f32 to vector<6x6x16xf32>
    %20 = arith.mulf %19, %18 : vector<6x6x16xf32>
    %21 = arith.addf %17, %20 : vector<6x6x16xf32>
    %22 = vector.extract_strided_slice %0 {offsets = [0, 7, 0], sizes = [6, 6, 16], strides = [1, 1, 1]} : vector<6x16x16xf32> to vector<6x6x16xf32>
    %cst_7 = arith.constant 0.111280762 : f32
    %23 = vector.broadcast %cst_7 : f32 to vector<6x6x16xf32>
    %24 = arith.mulf %23, %22 : vector<6x6x16xf32>
    %25 = arith.addf %21, %24 : vector<6x6x16xf32>
    %26 = vector.extract_strided_slice %0 {offsets = [0, 8, 0], sizes = [6, 6, 16], strides = [1, 1, 1]} : vector<6x16x16xf32> to vector<6x6x16xf32>
    %cst_8 = arith.constant 0.036632847 : f32
    %27 = vector.broadcast %cst_8 : f32 to vector<6x6x16xf32>
    %28 = arith.mulf %27, %26 : vector<6x6x16xf32>
    %29 = arith.addf %25, %28 : vector<6x6x16xf32>
    %cst_9 = arith.constant 0.000000e+00 : f32
    %30 = vector.broadcast %cst_9 : f32 to vector<6x6x6xf32>
    %31 = vector.extract_strided_slice %29 {offsets = [0, 0, 2], sizes = [6, 6, 6], strides = [1, 1, 1]} : vector<6x6x16xf32> to vector<6x6x6xf32>
    %cst_10 = arith.constant 0.036632847 : f32
    %32 = vector.broadcast %cst_10 : f32 to vector<6x6x6xf32>
    %33 = arith.mulf %32, %31 : vector<6x6x6xf32>
    %34 = arith.addf %30, %33 : vector<6x6x6xf32>
    %35 = vector.extract_strided_slice %29 {offsets = [0, 0, 3], sizes = [6, 6, 6], strides = [1, 1, 1]} : vector<6x6x16xf32> to vector<6x6x6xf32>
    %cst_11 = arith.constant 0.111280762 : f32
    %36 = vector.broadcast %cst_11 : f32 to vector<6x6x6xf32>
    %37 = arith.mulf %36, %35 : vector<6x6x6xf32>
    %38 = arith.addf %34, %37 : vector<6x6x6xf32>
    %39 = vector.extract_strided_slice %29 {offsets = [0, 0, 4], sizes = [6, 6, 6], strides = [1, 1, 1]} : vector<6x6x16xf32> to vector<6x6x6xf32>
    %cst_12 = arith.constant 0.216745317 : f32
    %40 = vector.broadcast %cst_12 : f32 to vector<6x6x6xf32>
    %41 = arith.mulf %40, %39 : vector<6x6x6xf32>
    %42 = arith.addf %38, %41 : vector<6x6x6xf32>
    %43 = vector.extract_strided_slice %29 {offsets = [0, 0, 5], sizes = [6, 6, 6], strides = [1, 1, 1]} : vector<6x6x16xf32> to vector<6x6x6xf32>
    %cst_13 = arith.constant 0.270682156 : f32
    %44 = vector.broadcast %cst_13 : f32 to vector<6x6x6xf32>
    %45 = arith.mulf %44, %43 : vector<6x6x6xf32>
    %46 = arith.addf %42, %45 : vector<6x6x6xf32>
    %47 = vector.extract_strided_slice %29 {offsets = [0, 0, 6], sizes = [6, 6, 6], strides = [1, 1, 1]} : vector<6x6x16xf32> to vector<6x6x6xf32>
    %cst_14 = arith.constant 0.216745317 : f32
    %48 = vector.broadcast %cst_14 : f32 to vector<6x6x6xf32>
    %49 = arith.mulf %48, %47 : vector<6x6x6xf32>
    %50 = arith.addf %46, %49 : vector<6x6x6xf32>
    %51 = vector.extract_strided_slice %29 {offsets = [0, 0, 7], sizes = [6, 6, 6], strides = [1, 1, 1]} : vector<6x6x16xf32> to vector<6x6x6xf32>
    %cst_15 = arith.constant 0.111280762 : f32
    %52 = vector.broadcast %cst_15 : f32 to vector<6x6x6xf32>
    %53 = arith.mulf %52, %51 : vector<6x6x6xf32>
    %54 = arith.addf %50, %53 : vector<6x6x6xf32>
    %55 = vector.extract_strided_slice %29 {offsets = [0, 0, 8], sizes = [6, 6, 6], strides = [1, 1, 1]} : vector<6x6x16xf32> to vector<6x6x6xf32>
    %cst_16 = arith.constant 0.036632847 : f32
    %56 = vector.broadcast %cst_16 : f32 to vector<6x6x6xf32>
    %57 = arith.mulf %56, %55 : vector<6x6x6xf32>
    %58 = arith.addf %54, %57 : vector<6x6x6xf32>
    %c0_17 = arith.constant 0 : index
    %c0_18 = arith.constant 0 : index
    %c0_19 = arith.constant 0 : index
    %59 = vector.load %arg2[%c0_17, %c0_18, %c0_19] : memref<6x6x6xf32, #tpu.memory_space<vmem>>, vector<6x6x6xf32>
    tpu.vector_store %arg2[%c0_17, %c0_18, %c0_19], %58 {strides = array<i32>} : memref<6x6x6xf32, #tpu.memory_space<vmem>>, vector<6x6x6xf32>,
    return
  }
  func.func @transform_0(%arg0: i32) -> (i32, i32, i32) {
    %c0_i32 = arith.constant 0 : i32
    %c0_i32_0 = arith.constant 0 : i32
    %c0_i32_1 = arith.constant 0 : i32
    return %arg0, %c0_i32, %c0_i32_0 : i32, i32, i32
  }
  func.func @transform_1(%arg0: i32) -> (i32, i32, i32) {
    %c0_i32 = arith.constant 0 : i32
    %c0_i32_0 = arith.constant 0 : i32
    %c0_i32_1 = arith.constant 0 : i32
    return %arg0, %c0_i32, %c0_i32_0 : i32, i32, i32
  }
}

module attributes {stable_mosaic.version = 11 : i64} {
  func.func @_color_stats_kernel(%arg0: i32, %arg1: memref<1x6x36xf32, #tpu.memory_space<vmem>>, %arg2: memref<1x3x6xf32, #tpu.memory_space<vmem>>) attributes {dimension_semantics = [#tpu.dimension_semantics<parallel>], iteration_bounds = array<i64: 2>, scalar_prefetch = 0 : i64, scratch_operands = 0 : i64, tpu.core_type = #tpu.core_type<tc>, window_params = [{transform_indices = @transform_0, window_bounds = array<i64: 1, 6, 36>}, {transform_indices = @transform_1, window_bounds = array<i64: 1, 3, 6>}]} {
    %c0 = arith.constant 0 : index
    %c0_0 = arith.constant 0 : index
    %c0_1 = arith.constant 0 : index
    %0 = vector.load %arg1[%c0, %c0_0, %c0_1] : memref<1x6x36xf32, #tpu.memory_space<vmem>>, vector<1x3x36xf32>
    %1 = vector.shape_cast %0 : vector<1x3x36xf32> to vector<3x36xf32>
    %c0_2 = arith.constant 0 : index
    %c0_3 = arith.constant 0 : index
    %c0_4 = arith.constant 0 : index
    %2 = vector.load %arg1[%c0_2, %c0_3, %c0_4] : memref<1x6x36xf32, #tpu.memory_space<vmem>>, vector<1x6x36xf32>
    %3 = vector.shape_cast %2 : vector<1x6x36xf32> to vector<6x36xf32>
    %cst = arith.constant dense<0.000000e+00> : vector<3x6xf32>
    %4 = tpu.matmul %1, %3, %cst {dimension_numbers = #tpu.dot_dimension_numbers<[1], [1], [0], [0], [0, 0, 1, 0], [], []>} : vector<3x36xf32>, vector<6x36xf32>, vector<3x6xf32> -> vector<3x6xf32>
    %c0_5 = arith.constant 0 : index
    %c0_6 = arith.constant 0 : index
    %c0_7 = arith.constant 0 : index
    %5 = vector.load %arg2[%c0_5, %c0_6, %c0_7] : memref<1x3x6xf32, #tpu.memory_space<vmem>>, vector<1x3x6xf32>
    %6 = vector.shape_cast %5 : vector<1x3x6xf32> to vector<3x6xf32>
    %7 = vector.shape_cast %4 : vector<3x6xf32> to vector<1x3x6xf32>
    tpu.vector_store %arg2[%c0_5, %c0_6, %c0_7], %7 {strides = array<i32>} : memref<1x3x6xf32, #tpu.memory_space<vmem>>, vector<1x3x6xf32>,
    return
  }
  func.func @transform_0(%arg0: i32) -> (i32, i32, i32) {
    %c0_i32 = arith.constant 0 : i32
    %c0_i32_0 = arith.constant 0 : i32
    %c0_i32_1 = arith.constant 0 : i32
    return %arg0, %c0_i32, %c0_i32_0 : i32, i32, i32
  }
  func.func @transform_1(%arg0: i32) -> (i32, i32, i32) {
    %c0_i32 = arith.constant 0 : i32
    %c0_i32_0 = arith.constant 0 : i32
    %c0_i32_1 = arith.constant 0 : i32
    return %arg0, %c0_i32, %c0_i32_0 : i32, i32, i32
  }
}

module attributes {stable_mosaic.version = 11 : i64} {
  func.func @_color_err_kernel(%arg0: i32, %arg1: memref<1x6x36xf32, #tpu.memory_space<vmem>>, %arg2: memref<2x3x3xf32, #tpu.memory_space<smem>>, %arg3: memref<1x1x36xf32, #tpu.memory_space<vmem>>) attributes {dimension_semantics = [#tpu.dimension_semantics<parallel>], iteration_bounds = array<i64: 2>, scalar_prefetch = 0 : i64, scratch_operands = 0 : i64, tpu.core_type = #tpu.core_type<tc>, window_params = [{transform_indices = @transform_0, window_bounds = array<i64: 1, 6, 36>}, {transform_indices = @transform_1, window_bounds = array<i64: 2, 3, 3>}, {transform_indices = @transform_2, window_bounds = array<i64: 1, 1, 36>}]} {
    %cst = arith.constant 0.000000e+00 : f32
    %0 = vector.broadcast %cst : f32 to vector<36xf32>
    %cst_0 = arith.constant 0.000000e+00 : f32
    %1 = vector.broadcast %cst_0 : f32 to vector<36xf32>
    %2 = arith.index_cast %arg0 : i32 to index
    %c0 = arith.constant 0 : index
    %c0_1 = arith.constant 0 : index
    %3 = memref.load %arg2[%2, %c0, %c0_1] : memref<2x3x3xf32, #tpu.memory_space<smem>>
    %c0_2 = arith.constant 0 : index
    %c0_3 = arith.constant 0 : index
    %c0_4 = arith.constant 0 : index
    %4 = vector.load %arg1[%c0_2, %c0_3, %c0_4] : memref<1x6x36xf32, #tpu.memory_space<vmem>>, vector<1x1x36xf32>
    %5 = vector.shape_cast %4 : vector<1x1x36xf32> to vector<36xf32>
    %6 = vector.broadcast %3 : f32 to vector<36xf32>
    %7 = arith.mulf %6, %5 : vector<36xf32>
    %8 = arith.addf %1, %7 : vector<36xf32>
    %9 = arith.index_cast %arg0 : i32 to index
    %c1 = arith.constant 1 : index
    %c0_5 = arith.constant 0 : index
    %10 = memref.load %arg2[%9, %c1, %c0_5] : memref<2x3x3xf32, #tpu.memory_space<smem>>
    %c0_6 = arith.constant 0 : index
    %c1_7 = arith.constant 1 : index
    %c0_8 = arith.constant 0 : index
    %11 = vector.load %arg1[%c0_6, %c1_7, %c0_8] : memref<1x6x36xf32, #tpu.memory_space<vmem>>, vector<1x1x36xf32>
    %12 = vector.shape_cast %11 : vector<1x1x36xf32> to vector<36xf32>
    %13 = vector.broadcast %10 : f32 to vector<36xf32>
    %14 = arith.mulf %13, %12 : vector<36xf32>
    %15 = arith.addf %8, %14 : vector<36xf32>
    %16 = arith.index_cast %arg0 : i32 to index
    %c2 = arith.constant 2 : index
    %c0_9 = arith.constant 0 : index
    %17 = memref.load %arg2[%16, %c2, %c0_9] : memref<2x3x3xf32, #tpu.memory_space<smem>>
    %c0_10 = arith.constant 0 : index
    %c2_11 = arith.constant 2 : index
    %c0_12 = arith.constant 0 : index
    %18 = vector.load %arg1[%c0_10, %c2_11, %c0_12] : memref<1x6x36xf32, #tpu.memory_space<vmem>>, vector<1x1x36xf32>
    %19 = vector.shape_cast %18 : vector<1x1x36xf32> to vector<36xf32>
    %20 = vector.broadcast %17 : f32 to vector<36xf32>
    %21 = arith.mulf %20, %19 : vector<36xf32>
    %22 = arith.addf %15, %21 : vector<36xf32>
    %c0_13 = arith.constant 0 : index
    %c3 = arith.constant 3 : index
    %c0_14 = arith.constant 0 : index
    %23 = vector.load %arg1[%c0_13, %c3, %c0_14] : memref<1x6x36xf32, #tpu.memory_space<vmem>>, vector<1x1x36xf32>
    %24 = vector.shape_cast %23 : vector<1x1x36xf32> to vector<36xf32>
    %25 = arith.subf %22, %24 : vector<36xf32>
    %cst_15 = arith.constant 2.550000e+02 : f32
    %26 = vector.broadcast %cst_15 : f32 to vector<36xf32>
    %27 = arith.mulf %25, %26 : vector<36xf32>
    %28 = arith.mulf %27, %27 : vector<36xf32>
    %29 = arith.addf %0, %28 : vector<36xf32>
    %cst_16 = arith.constant 0.000000e+00 : f32
    %30 = vector.broadcast %cst_16 : f32 to vector<36xf32>
    %31 = arith.index_cast %arg0 : i32 to index
    %c0_17 = arith.constant 0 : index
    %c1_18 = arith.constant 1 : index
    %32 = memref.load %arg2[%31, %c0_17, %c1_18] : memref<2x3x3xf32, #tpu.memory_space<smem>>
    %c0_19 = arith.constant 0 : index
    %c0_20 = arith.constant 0 : index
    %c0_21 = arith.constant 0 : index
    %33 = vector.load %arg1[%c0_19, %c0_20, %c0_21] : memref<1x6x36xf32, #tpu.memory_space<vmem>>, vector<1x1x36xf32>
    %34 = vector.shape_cast %33 : vector<1x1x36xf32> to vector<36xf32>
    %35 = vector.broadcast %32 : f32 to vector<36xf32>
    %36 = arith.mulf %35, %34 : vector<36xf32>
    %37 = arith.addf %30, %36 : vector<36xf32>
    %38 = arith.index_cast %arg0 : i32 to index
    %c1_22 = arith.constant 1 : index
    %c1_23 = arith.constant 1 : index
    %39 = memref.load %arg2[%38, %c1_22, %c1_23] : memref<2x3x3xf32, #tpu.memory_space<smem>>
    %c0_24 = arith.constant 0 : index
    %c1_25 = arith.constant 1 : index
    %c0_26 = arith.constant 0 : index
    %40 = vector.load %arg1[%c0_24, %c1_25, %c0_26] : memref<1x6x36xf32, #tpu.memory_space<vmem>>, vector<1x1x36xf32>
    %41 = vector.shape_cast %40 : vector<1x1x36xf32> to vector<36xf32>
    %42 = vector.broadcast %39 : f32 to vector<36xf32>
    %43 = arith.mulf %42, %41 : vector<36xf32>
    %44 = arith.addf %37, %43 : vector<36xf32>
    %45 = arith.index_cast %arg0 : i32 to index
    %c2_27 = arith.constant 2 : index
    %c1_28 = arith.constant 1 : index
    %46 = memref.load %arg2[%45, %c2_27, %c1_28] : memref<2x3x3xf32, #tpu.memory_space<smem>>
    %c0_29 = arith.constant 0 : index
    %c2_30 = arith.constant 2 : index
    %c0_31 = arith.constant 0 : index
    %47 = vector.load %arg1[%c0_29, %c2_30, %c0_31] : memref<1x6x36xf32, #tpu.memory_space<vmem>>, vector<1x1x36xf32>
    %48 = vector.shape_cast %47 : vector<1x1x36xf32> to vector<36xf32>
    %49 = vector.broadcast %46 : f32 to vector<36xf32>
    %50 = arith.mulf %49, %48 : vector<36xf32>
    %51 = arith.addf %44, %50 : vector<36xf32>
    %c0_32 = arith.constant 0 : index
    %c4 = arith.constant 4 : index
    %c0_33 = arith.constant 0 : index
    %52 = vector.load %arg1[%c0_32, %c4, %c0_33] : memref<1x6x36xf32, #tpu.memory_space<vmem>>, vector<1x1x36xf32>
    %53 = vector.shape_cast %52 : vector<1x1x36xf32> to vector<36xf32>
    %54 = arith.subf %51, %53 : vector<36xf32>
    %cst_34 = arith.constant 2.550000e+02 : f32
    %55 = vector.broadcast %cst_34 : f32 to vector<36xf32>
    %56 = arith.mulf %54, %55 : vector<36xf32>
    %57 = arith.mulf %56, %56 : vector<36xf32>
    %58 = arith.addf %29, %57 : vector<36xf32>
    %cst_35 = arith.constant 0.000000e+00 : f32
    %59 = vector.broadcast %cst_35 : f32 to vector<36xf32>
    %60 = arith.index_cast %arg0 : i32 to index
    %c0_36 = arith.constant 0 : index
    %c2_37 = arith.constant 2 : index
    %61 = memref.load %arg2[%60, %c0_36, %c2_37] : memref<2x3x3xf32, #tpu.memory_space<smem>>
    %c0_38 = arith.constant 0 : index
    %c0_39 = arith.constant 0 : index
    %c0_40 = arith.constant 0 : index
    %62 = vector.load %arg1[%c0_38, %c0_39, %c0_40] : memref<1x6x36xf32, #tpu.memory_space<vmem>>, vector<1x1x36xf32>
    %63 = vector.shape_cast %62 : vector<1x1x36xf32> to vector<36xf32>
    %64 = vector.broadcast %61 : f32 to vector<36xf32>
    %65 = arith.mulf %64, %63 : vector<36xf32>
    %66 = arith.addf %59, %65 : vector<36xf32>
    %67 = arith.index_cast %arg0 : i32 to index
    %c1_41 = arith.constant 1 : index
    %c2_42 = arith.constant 2 : index
    %68 = memref.load %arg2[%67, %c1_41, %c2_42] : memref<2x3x3xf32, #tpu.memory_space<smem>>
    %c0_43 = arith.constant 0 : index
    %c1_44 = arith.constant 1 : index
    %c0_45 = arith.constant 0 : index
    %69 = vector.load %arg1[%c0_43, %c1_44, %c0_45] : memref<1x6x36xf32, #tpu.memory_space<vmem>>, vector<1x1x36xf32>
    %70 = vector.shape_cast %69 : vector<1x1x36xf32> to vector<36xf32>
    %71 = vector.broadcast %68 : f32 to vector<36xf32>
    %72 = arith.mulf %71, %70 : vector<36xf32>
    %73 = arith.addf %66, %72 : vector<36xf32>
    %74 = arith.index_cast %arg0 : i32 to index
    %c2_46 = arith.constant 2 : index
    %c2_47 = arith.constant 2 : index
    %75 = memref.load %arg2[%74, %c2_46, %c2_47] : memref<2x3x3xf32, #tpu.memory_space<smem>>
    %c0_48 = arith.constant 0 : index
    %c2_49 = arith.constant 2 : index
    %c0_50 = arith.constant 0 : index
    %76 = vector.load %arg1[%c0_48, %c2_49, %c0_50] : memref<1x6x36xf32, #tpu.memory_space<vmem>>, vector<1x1x36xf32>
    %77 = vector.shape_cast %76 : vector<1x1x36xf32> to vector<36xf32>
    %78 = vector.broadcast %75 : f32 to vector<36xf32>
    %79 = arith.mulf %78, %77 : vector<36xf32>
    %80 = arith.addf %73, %79 : vector<36xf32>
    %c0_51 = arith.constant 0 : index
    %c5 = arith.constant 5 : index
    %c0_52 = arith.constant 0 : index
    %81 = vector.load %arg1[%c0_51, %c5, %c0_52] : memref<1x6x36xf32, #tpu.memory_space<vmem>>, vector<1x1x36xf32>
    %82 = vector.shape_cast %81 : vector<1x1x36xf32> to vector<36xf32>
    %83 = arith.subf %80, %82 : vector<36xf32>
    %cst_53 = arith.constant 2.550000e+02 : f32
    %84 = vector.broadcast %cst_53 : f32 to vector<36xf32>
    %85 = arith.mulf %83, %84 : vector<36xf32>
    %86 = arith.mulf %85, %85 : vector<36xf32>
    %87 = arith.addf %58, %86 : vector<36xf32>
    %88 = math.sqrt %87 : vector<36xf32>
    %c0_54 = arith.constant 0 : index
    %c0_55 = arith.constant 0 : index
    %c0_56 = arith.constant 0 : index
    %89 = vector.load %arg3[%c0_54, %c0_55, %c0_56] : memref<1x1x36xf32, #tpu.memory_space<vmem>>, vector<1x1x36xf32>
    %90 = vector.shape_cast %89 : vector<1x1x36xf32> to vector<36xf32>
    %91 = vector.shape_cast %88 : vector<36xf32> to vector<1x1x36xf32>
    tpu.vector_store %arg3[%c0_54, %c0_55, %c0_56], %91 {strides = array<i32>} : memref<1x1x36xf32, #tpu.memory_space<vmem>>, vector<1x1x36xf32>,
    return
  }
  func.func @transform_0(%arg0: i32) -> (i32, i32, i32) {
    %c0_i32 = arith.constant 0 : i32
    %c0_i32_0 = arith.constant 0 : i32
    %c0_i32_1 = arith.constant 0 : i32
    return %arg0, %c0_i32, %c0_i32_0 : i32, i32, i32
  }
  func.func @transform_1(%arg0: i32) -> (i32, i32, i32) {
    %c0_i32 = arith.constant 0 : i32
    %c0_i32_0 = arith.constant 0 : i32
    %c0_i32_1 = arith.constant 0 : i32
    %c0_i32_2 = arith.constant 0 : i32
    return %c0_i32, %c0_i32_0, %c0_i32_1 : i32, i32, i32
  }
  func.func @transform_2(%arg0: i32) -> (i32, i32, i32) {
    %c0_i32 = arith.constant 0 : i32
    %c0_i32_0 = arith.constant 0 : i32
    %c0_i32_1 = arith.constant 0 : i32
    return %arg0, %c0_i32, %c0_i32_0 : i32, i32, i32
  }
}

module attributes {stable_mosaic.version = 11 : i64} {
  func.func @_apply_color_kernel(%arg0: i32, %arg1: i32, %arg2: memref<1x3x16384xf32, #tpu.memory_space<vmem>>, %arg3: memref<2x3x3xf32, #tpu.memory_space<smem>>, %arg4: memref<1x3x16384xf32, #tpu.memory_space<vmem>>) attributes {dimension_semantics = [#tpu.dimension_semantics<parallel>, #tpu.dimension_semantics<parallel>], iteration_bounds = array<i64: 2, 1>, scalar_prefetch = 0 : i64, scratch_operands = 0 : i64, tpu.core_type = #tpu.core_type<tc>, window_params = [{transform_indices = @transform_0, window_bounds = array<i64: 1, 3, 16384>}, {transform_indices = @transform_1, window_bounds = array<i64: 2, 3, 3>}, {transform_indices = @transform_2, window_bounds = array<i64: 1, 3, 16384>}]} {
    %0 = arith.index_cast %arg0 : i32 to index
    %c0 = arith.constant 0 : index
    %c0_0 = arith.constant 0 : index
    %1 = memref.load %arg3[%0, %c0, %c0_0] : memref<2x3x3xf32, #tpu.memory_space<smem>>
    %c0_1 = arith.constant 0 : index
    %c0_2 = arith.constant 0 : index
    %c0_3 = arith.constant 0 : index
    %2 = vector.load %arg2[%c0_1, %c0_2, %c0_3] : memref<1x3x16384xf32, #tpu.memory_space<vmem>>, vector<1x1x16384xf32>
    %3 = vector.shape_cast %2 : vector<1x1x16384xf32> to vector<16384xf32>
    %4 = vector.broadcast %1 : f32 to vector<16384xf32>
    %5 = arith.mulf %4, %3 : vector<16384xf32>
    %6 = arith.index_cast %arg0 : i32 to index
    %c1 = arith.constant 1 : index
    %c0_4 = arith.constant 0 : index
    %7 = memref.load %arg3[%6, %c1, %c0_4] : memref<2x3x3xf32, #tpu.memory_space<smem>>
    %c0_5 = arith.constant 0 : index
    %c1_6 = arith.constant 1 : index
    %c0_7 = arith.constant 0 : index
    %8 = vector.load %arg2[%c0_5, %c1_6, %c0_7] : memref<1x3x16384xf32, #tpu.memory_space<vmem>>, vector<1x1x16384xf32>
    %9 = vector.shape_cast %8 : vector<1x1x16384xf32> to vector<16384xf32>
    %10 = vector.broadcast %7 : f32 to vector<16384xf32>
    %11 = arith.mulf %10, %9 : vector<16384xf32>
    %12 = arith.addf %5, %11 : vector<16384xf32>
    %13 = arith.index_cast %arg0 : i32 to index
    %c2 = arith.constant 2 : index
    %c0_8 = arith.constant 0 : index
    %14 = memref.load %arg3[%13, %c2, %c0_8] : memref<2x3x3xf32, #tpu.memory_space<smem>>
    %c0_9 = arith.constant 0 : index
    %c2_10 = arith.constant 2 : index
    %c0_11 = arith.constant 0 : index
    %15 = vector.load %arg2[%c0_9, %c2_10, %c0_11] : memref<1x3x16384xf32, #tpu.memory_space<vmem>>, vector<1x1x16384xf32>
    %16 = vector.shape_cast %15 : vector<1x1x16384xf32> to vector<16384xf32>
    %17 = vector.broadcast %14 : f32 to vector<16384xf32>
    %18 = arith.mulf %17, %16 : vector<16384xf32>
    %19 = arith.addf %12, %18 : vector<16384xf32>
    %c0_12 = arith.constant 0 : index
    %c0_13 = arith.constant 0 : index
    %c0_14 = arith.constant 0 : index
    %20 = vector.load %arg4[%c0_12, %c0_13, %c0_14] : memref<1x3x16384xf32, #tpu.memory_space<vmem>>, vector<1x1x16384xf32>
    %21 = vector.shape_cast %20 : vector<1x1x16384xf32> to vector<16384xf32>
    %22 = vector.shape_cast %19 : vector<16384xf32> to vector<1x1x16384xf32>
    tpu.vector_store %arg4[%c0_12, %c0_13, %c0_14], %22 {strides = array<i32>} : memref<1x3x16384xf32, #tpu.memory_space<vmem>>, vector<1x1x16384xf32>,
    %23 = arith.index_cast %arg0 : i32 to index
    %c0_15 = arith.constant 0 : index
    %c1_16 = arith.constant 1 : index
    %24 = memref.load %arg3[%23, %c0_15, %c1_16] : memref<2x3x3xf32, #tpu.memory_space<smem>>
    %c0_17 = arith.constant 0 : index
    %c0_18 = arith.constant 0 : index
    %c0_19 = arith.constant 0 : index
    %25 = vector.load %arg2[%c0_17, %c0_18, %c0_19] : memref<1x3x16384xf32, #tpu.memory_space<vmem>>, vector<1x1x16384xf32>
    %26 = vector.shape_cast %25 : vector<1x1x16384xf32> to vector<16384xf32>
    %27 = vector.broadcast %24 : f32 to vector<16384xf32>
    %28 = arith.mulf %27, %26 : vector<16384xf32>
    %29 = arith.index_cast %arg0 : i32 to index
    %c1_20 = arith.constant 1 : index
    %c1_21 = arith.constant 1 : index
    %30 = memref.load %arg3[%29, %c1_20, %c1_21] : memref<2x3x3xf32, #tpu.memory_space<smem>>
    %c0_22 = arith.constant 0 : index
    %c1_23 = arith.constant 1 : index
    %c0_24 = arith.constant 0 : index
    %31 = vector.load %arg2[%c0_22, %c1_23, %c0_24] : memref<1x3x16384xf32, #tpu.memory_space<vmem>>, vector<1x1x16384xf32>
    %32 = vector.shape_cast %31 : vector<1x1x16384xf32> to vector<16384xf32>
    %33 = vector.broadcast %30 : f32 to vector<16384xf32>
    %34 = arith.mulf %33, %32 : vector<16384xf32>
    %35 = arith.addf %28, %34 : vector<16384xf32>
    %36 = arith.index_cast %arg0 : i32 to index
    %c2_25 = arith.constant 2 : index
    %c1_26 = arith.constant 1 : index
    %37 = memref.load %arg3[%36, %c2_25, %c1_26] : memref<2x3x3xf32, #tpu.memory_space<smem>>
    %c0_27 = arith.constant 0 : index
    %c2_28 = arith.constant 2 : index
    %c0_29 = arith.constant 0 : index
    %38 = vector.load %arg2[%c0_27, %c2_28, %c0_29] : memref<1x3x16384xf32, #tpu.memory_space<vmem>>, vector<1x1x16384xf32>
    %39 = vector.shape_cast %38 : vector<1x1x16384xf32> to vector<16384xf32>
    %40 = vector.broadcast %37 : f32 to vector<16384xf32>
    %41 = arith.mulf %40, %39 : vector<16384xf32>
    %42 = arith.addf %35, %41 : vector<16384xf32>
    %c0_30 = arith.constant 0 : index
    %c1_31 = arith.constant 1 : index
    %c0_32 = arith.constant 0 : index
    %43 = vector.load %arg4[%c0_30, %c1_31, %c0_32] : memref<1x3x16384xf32, #tpu.memory_space<vmem>>, vector<1x1x16384xf32>
    %44 = vector.shape_cast %43 : vector<1x1x16384xf32> to vector<16384xf32>
    %45 = vector.shape_cast %42 : vector<16384xf32> to vector<1x1x16384xf32>
    tpu.vector_store %arg4[%c0_30, %c1_31, %c0_32], %45 {strides = array<i32>} : memref<1x3x16384xf32, #tpu.memory_space<vmem>>, vector<1x1x16384xf32>,
    %46 = arith.index_cast %arg0 : i32 to index
    %c0_33 = arith.constant 0 : index
    %c2_34 = arith.constant 2 : index
    %47 = memref.load %arg3[%46, %c0_33, %c2_34] : memref<2x3x3xf32, #tpu.memory_space<smem>>
    %c0_35 = arith.constant 0 : index
    %c0_36 = arith.constant 0 : index
    %c0_37 = arith.constant 0 : index
    %48 = vector.load %arg2[%c0_35, %c0_36, %c0_37] : memref<1x3x16384xf32, #tpu.memory_space<vmem>>, vector<1x1x16384xf32>
    %49 = vector.shape_cast %48 : vector<1x1x16384xf32> to vector<16384xf32>
    %50 = vector.broadcast %47 : f32 to vector<16384xf32>
    %51 = arith.mulf %50, %49 : vector<16384xf32>
    %52 = arith.index_cast %arg0 : i32 to index
    %c1_38 = arith.constant 1 : index
    %c2_39 = arith.constant 2 : index
    %53 = memref.load %arg3[%52, %c1_38, %c2_39] : memref<2x3x3xf32, #tpu.memory_space<smem>>
    %c0_40 = arith.constant 0 : index
    %c1_41 = arith.constant 1 : index
    %c0_42 = arith.constant 0 : index
    %54 = vector.load %arg2[%c0_40, %c1_41, %c0_42] : memref<1x3x16384xf32, #tpu.memory_space<vmem>>, vector<1x1x16384xf32>
    %55 = vector.shape_cast %54 : vector<1x1x16384xf32> to vector<16384xf32>
    %56 = vector.broadcast %53 : f32 to vector<16384xf32>
    %57 = arith.mulf %56, %55 : vector<16384xf32>
    %58 = arith.addf %51, %57 : vector<16384xf32>
    %59 = arith.index_cast %arg0 : i32 to index
    %c2_43 = arith.constant 2 : index
    %c2_44 = arith.constant 2 : index
    %60 = memref.load %arg3[%59, %c2_43, %c2_44] : memref<2x3x3xf32, #tpu.memory_space<smem>>
    %c0_45 = arith.constant 0 : index
    %c2_46 = arith.constant 2 : index
    %c0_47 = arith.constant 0 : index
    %61 = vector.load %arg2[%c0_45, %c2_46, %c0_47] : memref<1x3x16384xf32, #tpu.memory_space<vmem>>, vector<1x1x16384xf32>
    %62 = vector.shape_cast %61 : vector<1x1x16384xf32> to vector<16384xf32>
    %63 = vector.broadcast %60 : f32 to vector<16384xf32>
    %64 = arith.mulf %63, %62 : vector<16384xf32>
    %65 = arith.addf %58, %64 : vector<16384xf32>
    %c0_48 = arith.constant 0 : index
    %c2_49 = arith.constant 2 : index
    %c0_50 = arith.constant 0 : index
    %66 = vector.load %arg4[%c0_48, %c2_49, %c0_50] : memref<1x3x16384xf32, #tpu.memory_space<vmem>>, vector<1x1x16384xf32>
    %67 = vector.shape_cast %66 : vector<1x1x16384xf32> to vector<16384xf32>
    %68 = vector.shape_cast %65 : vector<16384xf32> to vector<1x1x16384xf32>
    tpu.vector_store %arg4[%c0_48, %c2_49, %c0_50], %68 {strides = array<i32>} : memref<1x3x16384xf32, #tpu.memory_space<vmem>>, vector<1x1x16384xf32>,
    return
  }
  func.func @transform_0(%arg0: i32, %arg1: i32) -> (i32, i32, i32) {
    %c0_i32 = arith.constant 0 : i32
    %c0_i32_0 = arith.constant 0 : i32
    return %arg0, %c0_i32, %arg1 : i32, i32, i32
  }
  func.func @transform_1(%arg0: i32, %arg1: i32) -> (i32, i32, i32) {
    %c0_i32 = arith.constant 0 : i32
    %c0_i32_0 = arith.constant 0 : i32
    %c0_i32_1 = arith.constant 0 : i32
    %c0_i32_2 = arith.constant 0 : i32
    return %c0_i32, %c0_i32_0, %c0_i32_1 : i32, i32, i32
  }
  func.func @transform_2(%arg0: i32, %arg1: i32) -> (i32, i32, i32) {
    %c0_i32 = arith.constant 0 : i32
    %c0_i32_0 = arith.constant 0 : i32
    return %arg0, %c0_i32, %arg1 : i32, i32, i32
  }
}

</mosaic_0001>

<bundles_post_ra>
// kernel: custom-call.8
= control target key start
LH: loop header
LB: loop body
LE: loop exit
PB: predicated region body
PF: predicated region fallthrough
CT: control target
= control target key end

     0   :  { %5 = vsyncpa [#allocation6], 0  ;;  %s911_s0 = inlined_call_operand.vmem [shape: f32[2,3,3], index: 0, kind: input, shape index: {}]   ;;  %s912_s1 = inlined_call_operand.vmem [shape: f32[2,3,3], index: 1, kind: output, shape index: {0}]   ;;  %s913_s2 = inlined_call_operand.hbm [shape: s32[2,3], index: 2, kind: output, shape index: {1}]   ;;  %s914_s3 = inlined_call_operand.vmem [shape: s32[2,3], index: 3, kind: output, shape index: {2}]  }
   0x1   :  { %7 = vsyncpa [#allocation6 + $0x1], 0  ;;  %s735_s12 = smov 0   ;;  %s737_s13 = smov 0  }
   0x2   :  { %s739_s14 = smov 0   ;;  %s741_s15 = smov 0  }
   0x3 LB: > { %s756_s16 = sadd.s32 4294967295, %s708_s15   ;;  %s571_s17 = sadd.s32 4294967294, %s708_s15   ;;  %s708_s15 = sphi %s741_s15, %s920_s15   ;;  %s704_s14 = sphi %s739_s14, %s919_s14   ;;  %s700_s13 = sphi %s737_s13, %s918_s13   ;;  %s696_s12 = sphi %s735_s12, %s917_s12  }
   0x4   : > { %s760_s18 = sadd.s32 1, %s708_s15   ;;  %s17_s19 = sshrl.u32 %s708_s15, 3 }
   0x5   : > { %s18_s20 = sshrl.u32 %s760_s18, 3  ;;  %s22_s21 = sadd.s32 1, %s704_s14 }
   0x6   : > { %s19_s22 = ssub.s32 %s17_s19, %s18_s20  ;;  %p32_p0 = scmp.ne.s32.totalorder %s704_s14, %s700_s13 }
   0x7   : > { %p20_p1 = scmp.eq.s32.totalorder %s19_s22, 0  ;;  %p33_p2 = scmp.eq.s32.totalorder %s756_s16, 1 }
   0x8   : > { %p38_p3 = scmp.ne.s32.totalorder %s700_s13, %s696_s12  ;;  %p39_p4 = scmp.eq.s32.totalorder %s571_s17, 1 }
   0x9   : > { %s771_s23 = scalar_select %p20_p1, %s704_s14, %s22_s21  }
   0xa   : > { %p773_p5 = por %p33_p2, %p32_p0  ;;  %p777_p6 = por %p39_p4, %p38_p3 }
   0xb   : > { %p573_p7 = scmp.ge.s32.totalorder %s708_s15, 2 }
   0xc   : > { %s85_s26 = sand.u32 (!%p573_p7), 1, %s708_s15   ;;  %s575_s27 = sshll.u32 (!%p573_p7), %s708_s15, 2 }
   0xd   : > { %83 = sbr.rel (%p573_p7) target bundleno = 20 (0x14), region = 16  ;;  %s574_s28 = sshll.u32 (!%p573_p7), %s85_s26, 2 }
   0xe   : > { %s89_s4 = scalar_lea.vmem (!%p573_p7), %s911_s0, %s575_s27  ;;  %s87_s5 = scalar_lea.vmem (!%p573_p7), [#allocation1], %s574_s28 }
  0x12   : > { %v106_v0 = vld [vmem:[%s89_s4] sm:$0xf] }
  0x13   : > { %107 = vst [vmem:[%s87_s5] sm:$0xf] %v106_v0 }
  0x14 PF: > { %p576_p8 = scmp.ge.s32.totalorder %s708_s15, 1  ;;  %p124_p9 = scmp.lt.s32.totalorder %s708_s15, 3 }
  0x16   : > { %p125_p10 = pnand %p576_p8, %p124_p9 }
  0x18   : > { %128 = sbr.rel (%p125_p10) target bundleno = 484 (0x1e4), region = 50 }
  0x1d   : > { %s135_s6 = sand.u32 1, %s756_s16   ;;  %s146_s7 = sand.u32 1, %s700_s13   ;;  %v168_v1 = vlaneseq  ;;  %v714_v4 = vmov 0  }
  0x1e   : > { %s793_s8 = sshll.u32 %s135_s6, 2  ;;  %s797_s9 = sshll.u32 %s146_s7, 1 }
  0x1f   : > { %v800_v2 = vshrl.u32 %v168_v1, 7  ;;  %s137_s10 = scalar_lea.vmem [#allocation1], %s793_s8  ;;  %s163_s11 = sand.u32 7, %s756_s16  }
  0x20   : > { %v157_v3 = vld [vmem:[%s137_s10] sm:$0xf]  ;;  %s805_s17 = scalar_lea.vmem [#allocation4], %s163_s11  ;;  %s141_s19 = scalar_lea.vmem [#allocation3], %s793_s8 }
  0x21   : > { %158 = vst [vmem:[#allocation0] sm:$0xf] %v157_v3  ;;  %s148_s20 = scalar_lea.vmem [#allocation5], %s797_s9  ;;  %s154_s21 = scalar_lea.vmem [#allocation8], %s797_s9 }
  0x22   : > { %172 = vst [vmem:[#allocation9] sm:$0xff] %v800_v2  ;;  %s811_s22 = scalar_lea.vmem [#allocation7], %s163_s11  ;;  %s813_s26 = smov 0  }
  0x23   : > { %167 = vst [vmem:[%s805_s17] sm:$0x1] %v714_v4 }
  0x28   : > { %v161_v5 = vld [vmem:[#allocation0] sm:$0xff] }
  0x29   : > { %162 = vst [vmem:[#allocation2] sm:$0xff] %v161_v5 }
  0x2a LB: >> { %vm188_vm0 = vcmp.lt.s32.totalorder %v800_v2, 3  ;;  %v820_v8 = vstv %s712_s26  ;;  %s229_s27 = ssub.s32 128, %s712_s26  ;;  %v235_v39 = vand.u32 127, %v168_v1  ;;  %s241_s28 = scalar_lea.vmem [#allocation2], %s712_s26  ;;  %v238_v42 = vld [vmem:[%s805_s17] ss:$0 sm:$0xff]  ;;  %s712_s26 = sphi %s813_s26, %s178_s26  }
  0x2b   : >> { %vm187_vm1 = vcmp.ge.s32.totalorder %v800_v2, %v820_v8  ;;  %s247_s4 = scalar_lea.vmem [#allocation9], %s712_s26  ;;  %vm267_vm14 = vcmp.gt.s32.totalorder %v800_v2, %v820_v8  ;;  %s178_s26 = sadd.s32 1, %s712_s26  }
  0x2c   : >> { %vm189_vm3 = vmand %vm187_vm1, %vm188_vm0  ;;  %vm236_vm12 = vcmp.eq.s32.totalorder %v235_v39, %v820_v8  ;;  %v249_v44 = vld [vmem:[%s247_s4] ss:$0 sm:$0xff]  ;;  %p175_p11 = scmp.ge.s32.totalorder %s178_s26, 3  }
  0x2d   : > { %s409_s6 = sshrl.u32 (%p175_p11), %s756_s16, 3  ;;  %s415_s26 = sshll.u32 (%p175_p11), %s148_s20, 4  ;;  %s416_s26 = int_to_ptr.vmem [resolvable:$true] %s415_s26 }
  0x2e   : > { %s852_s10 = sshll.u32 (%p175_p11), %s409_s6, 1  ;;  %s363_s6 = scalar_lea.sflag (%p175_p11), [#allocation6], %s146_s7 }
  0x30   : >> { %v183_v6 = vld [vmem:[#allocation2] sm:$0xff]  ;;  %v243_v40 = vld [vmem:[%s241_s28] ss:$0 sm:$0xff] }
  0x31   : >> { %v184_v7 = vand.u32 2147483647, %v183_v6 }
  0x33   : >> { %vm581_vm2 = vcmp.gt.f32.partialorder %v184_v7, -inf }
  0x34   : >> { %vm191_vm4 = vmand %vm189_vm3, %vm581_vm2 }
  0x35   : >> { %v192_v9 = vsel %vm191_vm4, %v800_v2, %v820_v8  ;;  %v193_v10 = vsel %vm191_vm4, %v184_v7, -inf  ;;  %vm284_vm4 = vmand %vm267_vm14, %vm236_vm12 }
  0x36   : >> { %v194_v11 = vrot.slane %v193_v10, 1  ;;  %v195_v12 = vrot.slane %v192_v9, 1 }
  0x38   : >> { %vm196_vm5 = vcmp.ge.f32.partialorder %v194_v11, %v193_v10  ;;  %v199_v13 = vrot.slane %v194_v11, 1  ;;  %v200_v14 = vrot.slane %v195_v12, 1 }
  0x39   : >> { %v197_v15 = vsel %vm196_vm5, %v194_v11, %v193_v10  ;;  %v198_v16 = vsel %vm196_vm5, %v195_v12, %v192_v9  ;;  %vm259_vm5 = vcmp.gt.s32.totalorder %v235_v39, %v820_v8 }
  0x3a   : >> { %vm201_vm6 = vcmp.ge.f32.partialorder %v199_v13, %v197_v15  ;;  %v204_v17 = vrot.slane %v199_v13, 1  ;;  %v205_v18 = vrot.slane %v200_v14, 1 }
  0x3b   : >> { %v202_v19 = vsel %vm201_vm6, %v199_v13, %v197_v15  ;;  %v203_v20 = vsel %vm201_vm6, %v200_v14, %v198_v16 }
  0x3c   : >> { %vm206_vm7 = vcmp.ge.f32.partialorder %v204_v17, %v202_v19  ;;  %v209_v21 = vrot.slane %v204_v17, 1  ;;  %v210_v22 = vrot.slane %v205_v18, 1 }
  0x3d   : >> { %v207_v23 = vsel %vm206_vm7, %v204_v17, %v202_v19  ;;  %v208_v24 = vsel %vm206_vm7, %v205_v18, %v203_v20 }
  0x3e   : >> { %vm211_vm8 = vcmp.ge.f32.partialorder %v209_v21, %v207_v23  ;;  %v214_v25 = vrot.slane %v209_v21, 1  ;;  %v215_v26 = vrot.slane %v210_v22, 1 }
  0x3f   : >> { %v212_v27 = vsel %vm211_vm8, %v209_v21, %v207_v23  ;;  %v213_v28 = vsel %vm211_vm8, %v210_v22, %v208_v24 }
  0x40   : >> { %vm216_vm9 = vcmp.ge.f32.partialorder %v214_v25, %v212_v27  ;;  %v219_v29 = vrot.slane %v214_v25, 1  ;;  %v220_v30 = vrot.slane %v215_v26, 1 }
  0x41   : >> { %v217_v31 = vsel %vm216_vm9, %v214_v25, %v212_v27  ;;  %v218_v32 = vsel %vm216_vm9, %v215_v26, %v213_v28 }
  0x42   : >> { %vm221_vm10 = vcmp.ge.f32.partialorder %v219_v29, %v217_v31  ;;  %v224_v33 = vrot.slane %v219_v29, 1  ;;  %v225_v34 = vrot.slane %v220_v30, 1 }
  0x43   : >> { %v222_v35 = vsel %vm221_vm10, %v219_v29, %v217_v31  ;;  %v223_v36 = vsel %vm221_vm10, %v220_v30, %v218_v32 }
  0x44   : >> { %vm226_vm11 = vcmp.ge.f32.partialorder %v224_v33, %v222_v35 }
  0x45   : >> { %v228_v37 = vsel %vm226_vm11, %v225_v34, %v223_v36 }
  0x46   : >> { %230 = vrot.lane.b32.xlu0 %v228_v37, %s229_s27 }
  0xb8   : >> { %v231_v38 = vpop.permute.xlu0 %230 }
  0xb9   : >> { %590 = vpush %v231_v38 }
  0xea   : >> { %s591_s29 = spop %590 }
  0xeb   : >> { %v237_v41 = vstv %s591_s29  ;;  %s242_s30 = scalar_lea.vmem [#allocation2], %s591_s29  ;;  %s248_s5 = scalar_lea.vmem [#allocation9], %s591_s29 }
  0xec   : >> { %v244_v43 = vld [vmem:[%s242_s30] ss:$0 sm:$0xff]  ;;  %v239_v46 = vsel %vm236_vm12, %v237_v41, %v238_v42 }
  0xed   : >> { %v250_v45 = vld [vmem:[%s248_s5] ss:$0 sm:$0xff]  ;;  %245 = vst [vmem:[%s242_s30] sm:$0x1] %v243_v40  ;;  %vm253_vm13 = vcmp.ne.f32.partialorder %v244_v43, 0.0  ;;  %v260_v62 = vsel %vm259_vm5, %v244_v43, 0.0 }
  0xee   : >> { %246 = vst [vmem:[%s241_s28] sm:$0x1] %v244_v43  ;;  %vm254_vm15 = vmand %vm236_vm12, %vm253_vm13  ;;  %s413_s28 = scalar_lea.hbm (%p175_p11), %s913_s2, %s852_s10 }
  0xef   : >> { %251 = vst [vmem:[%s248_s5] sm:$0x1] %v249_v44  ;;  %v255_v47 = vsel %vm254_vm15, %v244_v43, 1.0  ;;  %s417_s29 = sshll.u32 (%p175_p11), %s413_s28, 4  ;;  %s418_s29 = int_to_ptr.hbm [resolvable:$true] %s417_s29 }
  0xf0   : >> { %252 = vst [vmem:[%s247_s4] sm:$0x1] %v250_v45  ;;  %v268_v48 = vsel %vm267_vm14, %v255_v47, 1.0  ;;  %s656_s11 = sshra.s32 (%p175_p11), %s418_s29, 4  ;;  %s657_s11 = int_to_ptr.hbm [resolvable:$true] %s656_s11 }
  0xf1   : >> { %640 = vrcp.f32 %v268_v48  ;;  %240 = vst [vmem:[%s805_s17] sm:$0x1] %v239_v46  ;;  %v280_v52 = vand.u32 2147483648, %v268_v48  ;;  %v278_v54 = vand.u32 2147483647, %v268_v48  ;;  %vm274_vm1 = vweird.f32 %v268_v48  ;;  %s585_s17 = sshll.u32 (%p175_p11), %s756_s16, 2  ;;  %s658_s16 = scalar_lea.hbm (%p175_p11), %s657_s11, 2 }
  0xf2   : > { %s372_s5 = scalar_lea.vmem (%p175_p11), %s912_s1, %s585_s17  ;;  %p659_p12 = scmp.ne.s32.totalorder (%p175_p11), %s657_s11, %s658_s16 }
  0xf3   : >> { %v281_v56 = vor.u32 1.1754944e-38, %v280_v52  ;;  %vm279_vm3 = vcmp.eq.f32.partialorder %v278_v54, 8.507059e+37  ;;  %s662_s17 = scalar_lea.hbm (%p175_p11), %s913_s2, 2  ;;  %p663_p1 = scmp.lt.s32.totalorder (%p175_p11), %s657_s11, %s913_s2 }
  0xf4   : > { %p660_p13 = pnand (%p175_p11), %p659_p12, %p773_p5  ;;  %p664_p2 = scmp.lt.s32.totalorder (%p175_p11), %s662_s17, %s658_s16 }
  0xf5   : >> { %v264_v58 = vld [vmem:[#allocation2] sm:$0xff] }
  0xf6   : > { %p661_p0 = pneg (%p175_p11), %p660_p13  ;;  %p665_p3 = por (%p175_p11), %p664_p2, %p663_p1 }
  0xf7   : >> { %v641_v49 = vpop.eup %640  ;;  %v291_v4 = vld [vmem:[#allocation9] sm:$0xff] (%p175_p11) }
  0xf8   : >> { %v270_v50 = vmul.f32 %v641_v49, %v268_v48  ;;  %vm275_vm0 = vweird.f32 %v641_v49  ;;  %v348_v1 = vld [vmem:[#allocation4] sm:$0x3] (%p175_p11)  ;;  %p666_p4 = pnand (%p175_p11), %p665_p3, %p661_p0 }
  0xf9   : >> { %vm276_vm2 = vmor %vm274_vm1, %vm275_vm0  ;;  %351 = vst [vmem:[%s148_s20] sm:$0x3] (%p175_p11), %v348_v1 }
  0xfa   : >> { %v271_v51 = vsub.f32 1.0, %v270_v50 }
  0xfc   : >> { %v272_v53 = vmul.f32 %v641_v49, %v271_v51 }
  0xfe   : >> { %v273_v55 = vadd.f32 %v641_v49, %v272_v53 }
 0x100   : >> { %v277_v57 = vsel %vm276_vm2, %v641_v49, %v273_v55 }
 0x101   : >> { %v282_v59 = vsel %vm279_vm3, %v281_v56, %v277_v57 }
 0x102   : >> { %v283_v60 = vmul.f32 %v282_v59, %v264_v58 }
 0x104   : >> { %v285_v61 = vsel %vm284_vm4, %v283_v60, 0.0 }
 0x105   : >> { %286 = vadd.xlane.f32.xlu0 %v285_v61 }
 0x12e   : > { %307 = vxpose.xlu0.b32.start.end [1/1] (short) (narrow) (%p175_p11), %v291_v4, 8 }
 0x178   : >> { %v287_v63 = vpop.xlane.xlu0 %286 }
 0x179   : >> { %v288_v0 = vmul.f32 %v287_v63, %v260_v62  ;;  %177 = sbr.rel (!%p175_p11) target bundleno = 42 (0x2a), region = 202 }
 0x17b   : >> { %v289_v3 = vsub.f32 %v283_v60, %v288_v0 }
 0x17d   : >> { %290 = vst [vmem:[#allocation2] sm:$0xff] %v289_v3 }
 0x184   : > { %v342_v5 = vld [vmem:[#allocation2] sm:$0xf] }
 0x185   : > { %345 = vst [vmem:[%s141_s19] sm:$0xf] %v342_v5 }
 0x18c   : > { %v389_v2 = vld [vmem:[%s141_s19] sm:$0xf] }
 0x18d   : > { %390 = vst [vmem:[%s372_s5] sm:$0xf] %v389_v2 }
 0x18e   : > { %669 = shalt.err (!%p666_p4)
}
 0x18f   : > { %592 = dma.vmem_to_hbm [thread:$0]  (%p773_p5), %s416_s26, 32, %s418_s29, %s363_s6  }
 0x190   : > { %s426_s19 = scalar_lea.vmem (%p773_p5), %s914_s3, %s852_s10 }
 0x1d2   : > { %v323_v6 = vpop.trf.xlu0 }
 0x1d3   : > { %339 = vst [vmem:[%s811_s22] sm:$0x1] %v323_v6 }
 0x1d7   : > { %423 = sbr.rel (!%p773_p5) target bundleno = 484 (0x1e4), region = 96 }
 0x1da   : > { %v354_v7 = vld [vmem:[#allocation7] sm:$0x3] }
 0x1db   : > { %357 = vst [vmem:[%s154_s21] sm:$0x3] %v354_v7 }
 0x1e2   : > { %v443_v8 = vld [vmem:[%s154_s21] sm:$0x3] }
 0x1e3   : > { %444 = vst [vmem:[%s426_s19] sm:$0x3] %v443_v8 }
 0x1e4 PF: > { %s472_s20 = sand.u32 1, %s696_s12   ;;  %p595_p8 = pnand %p573_p7, %p777_p6 }
 0x1e5   : > { %s473_s24 = scalar_lea.sflag [#allocation6], %s472_s20 }
 0x1e6   : > { %p596_p9 = pneg %p595_p8 }
 0x1e8   : > { %691 = dma.done.wait (%p596_p9), %s473_s24, 32  }
 0x1e9   : > { %693 = vsyncadd (%p596_p9), %s473_s24, 4294967264  ;;  %p10_p5 = scmp.ge.s32.totalorder %s760_s18, 4   ;;  %s917_s12 = smov %s700_s13 }
 0x1ea   : > { %s918_s13 = smov %s704_s14  ;;  %s919_s14 = smov %s771_s23 }
 0x1eb   : > { %s920_s15 = smov %s760_s18  ;;  %12 = sbr.rel (!%p10_p5) target bundleno = 3 (0x3), region = 213 }
 0x1f0   :  { %486 = vsyncpa [#allocation6], 1 }
 0x1f1   :  { %488 = vsyncpa [#allocation6 + $0x1], 1 }

// kernel: _lambda_.5
= control target key start
LH: loop header
LB: loop body
LE: loop exit
PB: predicated region body
PF: predicated region fallthrough
CT: control target
= control target key end

     0   :  { %s219_s6 = smov 0   ;;  %s239_s0 = inlined_call_operand.vmem [shape: f32[2,6,36], index: 0, kind: input, shape index: {}]   ;;  %s240_s1 = inlined_call_operand.vmem [shape: f32[2,3,6], index: 1, kind: output, shape index: {}]  }
   0x1 LB: > { %s196_s7 = sadd.s32 4294967295, %s221_s6   ;;  %p200_p0 = scmp.ge.s32.totalorder %s221_s6, 1  ;;  %s221_s6 = sphi %s219_s6, %s11_s6  }
   0x2   : > { %p86_p1 = scmp.lt.s32.totalorder %s221_s6, 3 }
   0x4   : > { %p87_p2 = pnand %p200_p0, %p86_p1 }
   0x5   : > { %p104_p3 = scmp.lt.s32.totalorder (!%p87_p2), %s196_s7, 1 }
   0x6   : > { %90 = sbr.rel (%p87_p2) target bundleno = 145 (0x91), region = 24 }
   0xb   : > { %s242_s7 = smov (!%p104_p3, %s196_s7), 1  ;;  %vm114_vm0 = vcmask 293888   ;;  %vm141_vm1 = vcmask 43008  }
   0xc   : > { %s201_s8 = sshll.u32 %s242_s7, 3  ;;  %s202_s12 = sshll.u32 %s242_s7, 2 }
   0xd   : > { %s107_s11 = scalar_lea.vmem %s239_s0, %s201_s8  ;;  %s111_s15 = scalar_lea.vmem %s240_s1, %s202_s12 }
   0xe   : > { %v113_v0 = vld [vmem:[%s107_s11] sm:$0x3f] }
   0xf   : > { %203 = vmatpush.xpose.msk.msra.mxu0 %vm114_vm0, %v113_v0  ;;  %v112_v1 = vld [vmem:[%s107_s11] sm:$0x7] }
  0x12   : > { %204 = vmatmul.msk.f32.vlgmr.msra.gmra.mxu0 %vm114_vm0, %v112_v1 }
  0x8f   : > { %v138_v2 = vpop.f32.mrf.mxu0 }
  0x90   : > { %142 = vst.msk [vmem:[%s111_s15] sm:$0x7] %vm141_vm1, %v138_v2 }
  0x91 PF: > { %s11_s6 = sadd.s32 1, %s221_s6  }
  0x92   : > { %p8_p4 = scmp.ge.s32.totalorder %s11_s6, 4  }
  0x94   :  { %10 = sbr.rel (!%p8_p4) target bundleno = 1 (0x1), region = 54 }

// kernel: _lambda_.4
= control target key start
LH: loop header
LB: loop body
LE: loop exit
PB: predicated region body
PF: predicated region fallthrough
CT: control target
= control target key end

     0   :  { %s738_s6 = smov 0   ;;  %s870_s0 = inlined_call_operand.vmem [shape: f32[12,16,16], index: 0, kind: input, shape index: {}]   ;;  %s871_s1 = inlined_call_operand.vmem [shape: f32[12,6,6], index: 1, kind: output, shape index: {}]  }
   0x1 LB: > { %s689_s7 = sadd.s32 4294967295, %s720_s6   ;;  %p693_p0 = scmp.ge.s32.totalorder %s720_s6, 1  ;;  %s720_s6 = sphi %s738_s6, %s11_s6  }
   0x2   : > { %p89_p1 = scmp.lt.s32.totalorder %s720_s6, 3 }
   0x4   : > { %p90_p2 = pnand %p693_p0, %p89_p1 }
   0x5   : > { %s110_s8 = smul.u32 (!%p90_p2), 6, %s689_s7  ;;  %s722_s13 = smov (!%p90_p2), 127  }
   0x6   : > { %93 = sbr.rel (%p90_p2) target bundleno = 384 (0x180), region = 24  ;;  %s723_s14 = smov (!%p90_p2), 126  }
   0x7   : > { %p111_p3 = scmp.lt.s32.totalorder (!%p90_p2), %s110_s8, 11  ;;  %s724_s15 = smov (!%p90_p2), 125  }
   0x8   : > { %s725_s16 = smov (!%p90_p2), 124   ;;  %s726_s17 = smov (!%p90_p2), 123  }
   0x9   : > { %s727_s18 = smov (!%p90_p2), 122  }
   0xb   : > { %s873_s8 = smov (!%p111_p3, %s110_s8), 11  ;;  %vm171_vm0 = vcmask 1046528   ;;  %vm226_vm1 = vcmask 1045504   ;;  %vm281_vm2 = vcmask 1044480   ;;  %vm312_vm3 = vcmask 1043456  }
   0xc   : > { %s699_s9 = sshll.u32 %s873_s8, 4  ;;  %vm343_vm4 = vcmask 1042432   ;;  %s696_s19 = sshll.u32 %s873_s8, 3  ;;  %vm626_vm5 = vcmask 48130  }
   0xd   : > { %s752_s12 = scalar_lea.vmem %s870_s0, %s699_s9  ;;  %s121_s22 = scalar_lea.vmem %s871_s1, %s696_s19 }
   0xe   : > { %v131_v0 = vld [vmem:[%s752_s12 + $0x40] sm:$0xff]  ;;  %v132_v1 = vld [vmem:[%s752_s12 + $0x48] sm:$0xff] }
   0xf   : > { %v139_v2 = vmul.f32 0.036632847, %v131_v0  ;;  %v155_v3 = vmul.f32 0.11128076, %v131_v0  ;;  %v156_v4 = vmul.f32 0.11128076, %v132_v1 }
  0x10   : > { %v210_v5 = vmul.f32 0.21674532, %v131_v0  ;;  %v211_v6 = vmul.f32 0.21674532, %v132_v1  ;;  %v265_v7 = vmul.f32 0.27068216, %v131_v0 }
  0x11   : > { %v184_v8 = vrot.slane %v155_v3, 1  ;;  %v185_v9 = vrot.slane %v156_v4, 1  ;;  %v266_v10 = vmul.f32 0.27068216, %v132_v1  ;;  %v356_v11 = vrot.slane %v155_v3, 5  ;;  %v127_v16 = vld [vmem:[%s752_s12 + $0x20] sm:$0xff] }
  0x12   : > { %v239_v12 = vrot.slane %v210_v5, 2  ;;  %v240_v13 = vrot.slane %v211_v6, 2  ;;  %v294_v14 = vrot.slane %v265_v7, 3  ;;  %v325_v15 = vrot.slane %v210_v5, 4  ;;  %v128_v21 = vld [vmem:[%s752_s12 + $0x28] sm:$0xff]  ;;  %v123_v50 = vld [vmem:[%s752_s12] sm:$0xff] }
  0x13   : > { %v186_v17 = vsel %vm171_vm0, %v184_v8, %v185_v9  ;;  %v295_v18 = vrot.slane %v266_v10, 3  ;;  %v326_v19 = vrot.slane %v211_v6, 4  ;;  %v357_v20 = vrot.slane %v156_v4, 5  ;;  %v124_v51 = vld [vmem:[%s752_s12 + $0x8] sm:$0xff] }
  0x14   : > { %v200_v22 = vadd.f32 %v186_v17, %v139_v2  ;;  %v241_v23 = vsel %vm226_vm1, %v239_v12, %v240_v13  ;;  %v378_v24 = vmul.f32 0.036632847, %v132_v1  ;;  %v137_v25 = vmul.f32 0.036632847, %v127_v16 }
  0x15   : > { %v296_v26 = vsel %vm281_vm2, %v294_v14, %v295_v18  ;;  %v327_v27 = vsel %vm312_vm3, %v325_v15, %v326_v19  ;;  %v358_v28 = vsel %vm343_vm4, %v356_v11, %v357_v20  ;;  %v151_v29 = vmul.f32 0.11128076, %v127_v16 }
  0x16   : > { %v255_v30 = vadd.f32 %v241_v23, %v200_v22  ;;  %v390_v31 = vrot.slane %v378_v24, 6  ;;  %v152_v32 = vmul.f32 0.11128076, %v128_v21  ;;  %v206_v33 = vmul.f32 0.21674532, %v127_v16 }
  0x17   : > { %v178_v34 = vrot.slane %v151_v29, 1  ;;  %v207_v35 = vmul.f32 0.21674532, %v128_v21  ;;  %v261_v36 = vmul.f32 0.27068216, %v127_v16  ;;  %v350_v37 = vrot.slane %v151_v29, 5 }
  0x18   : > { %v310_v38 = vadd.f32 %v296_v26, %v255_v30  ;;  %v179_v39 = vrot.slane %v152_v32, 1  ;;  %v233_v40 = vrot.slane %v206_v33, 2  ;;  %v262_v41 = vmul.f32 0.27068216, %v128_v21  ;;  %v133_v16 = vld [vmem:[%s752_s12 + $0x50] sm:$0xff] }
  0x19   : > { %v234_v42 = vrot.slane %v207_v35, 2  ;;  %v288_v43 = vrot.slane %v261_v36, 3  ;;  %v319_v44 = vrot.slane %v206_v33, 4  ;;  %v320_v45 = vrot.slane %v207_v35, 4 }
  0x1a   : > { %v341_v46 = vadd.f32 %v327_v27, %v310_v38  ;;  %v180_v47 = vsel %vm171_vm0, %v178_v34, %v179_v39  ;;  %v289_v48 = vrot.slane %v262_v41, 3  ;;  %v351_v49 = vrot.slane %v152_v32, 5 }
  0x1b   : > { %v198_v52 = vadd.f32 %v180_v47, %v137_v25  ;;  %v235_v53 = vsel %vm226_vm1, %v233_v40, %v234_v42  ;;  %v321_v54 = vsel %vm312_vm3, %v319_v44, %v320_v45  ;;  %v376_v55 = vmul.f32 0.036632847, %v128_v21  ;;  %v134_v21 = vld [vmem:[%s752_s12 + $0x58] sm:$0xff] }
  0x1c   : > { %v372_v56 = vadd.f32 %v358_v28, %v341_v46  ;;  %v290_v57 = vsel %vm281_vm2, %v288_v43, %v289_v48  ;;  %v352_v58 = vsel %vm343_vm4, %v350_v37, %v351_v49  ;;  %v135_v59 = vmul.f32 0.036632847, %v123_v50 }
  0x1d   : > { %v253_v60 = vadd.f32 %v235_v53, %v198_v52  ;;  %v388_v61 = vrot.slane %v376_v55, 6  ;;  %v147_v62 = vmul.f32 0.11128076, %v123_v50  ;;  %v148_v63 = vmul.f32 0.11128076, %v124_v51  ;;  %v130_v55 = vld [vmem:[%s752_s12 + $0x38] sm:$0xff] }
  0x1e   : > { %v770_v0 = vadd.f32 %v390_v31, %v372_v56  ;;  %v202_v1 = vmul.f32 0.21674532, %v123_v50  ;;  %v203_v2 = vmul.f32 0.21674532, %v124_v51  ;;  %v257_v3 = vmul.f32 0.27068216, %v123_v50 }
  0x1f   : > { %v308_v4 = vadd.f32 %v290_v57, %v253_v60  ;;  %v172_v5 = vrot.slane %v147_v62, 1  ;;  %v173_v6 = vrot.slane %v148_v63, 1  ;;  %v258_v7 = vmul.f32 0.27068216, %v124_v51  ;;  %v129_v50 = vld [vmem:[%s752_s12 + $0x30] sm:$0xff] }
  0x20   : > { %v773_v8 = vmul.f32 0.11128076, %v770_v0  ;;  %v227_v9 = vrot.slane %v202_v1, 2  ;;  %v228_v10 = vrot.slane %v203_v2, 2  ;;  %v282_v11 = vrot.slane %v257_v3, 3 }
  0x21   : > { %v339_v12 = vadd.f32 %v321_v54, %v308_v4  ;;  %v174_v13 = vsel %vm171_vm0, %v172_v5, %v173_v6  ;;  %v283_v14 = vrot.slane %v258_v7, 3  ;;  %v313_v15 = vrot.slane %v202_v1, 4 }
  0x22   : > { %436 = vrot.lane.b32.xlu2 %v773_v8, %s722_s13  ;;  %v196_v17 = vadd.f32 %v174_v13, %v135_v59  ;;  %v229_v18 = vsel %vm226_vm1, %v227_v9, %v228_v10  ;;  %v314_v19 = vrot.slane %v203_v2, 4  ;;  %v344_v20 = vrot.slane %v147_v62, 5 }
  0x23   : > { %v370_v22 = vadd.f32 %v352_v58, %v339_v12  ;;  %v284_v23 = vsel %vm281_vm2, %v282_v11, %v283_v14  ;;  %v345_v24 = vrot.slane %v148_v63, 5  ;;  %v374_v25 = vmul.f32 0.036632847, %v124_v51 }
  0x24   : > { %v251_v26 = vadd.f32 %v229_v18, %v196_v17  ;;  %v315_v27 = vsel %vm312_vm3, %v313_v15, %v314_v19  ;;  %v140_v28 = vmul.f32 0.036632847, %v133_v16  ;;  %v157_v29 = vmul.f32 0.11128076, %v133_v16 }
  0x25   : > { %v783_v30 = vadd.f32 %v388_v61, %v370_v22  ;;  %v346_v31 = vsel %vm343_vm4, %v344_v20, %v345_v24  ;;  %v386_v32 = vrot.slane %v374_v25, 6  ;;  %v158_v33 = vmul.f32 0.11128076, %v134_v21  ;;  %v125_v22 = vld [vmem:[%s752_s12 + $0x10] sm:$0xff] }
  0x26   : > { %v306_v34 = vadd.f32 %v284_v23, %v251_v26  ;;  %v187_v35 = vrot.slane %v157_v29, 1  ;;  %v212_v36 = vmul.f32 0.21674532, %v133_v16  ;;  %v213_v37 = vmul.f32 0.21674532, %v134_v21  ;;  %v126_v23 = vld [vmem:[%s752_s12 + $0x18] sm:$0xff] }
  0x27   : > { %v787_v38 = vmul.f32 0.11128076, %v783_v30  ;;  %v188_v39 = vrot.slane %v158_v33, 1  ;;  %v267_v40 = vmul.f32 0.27068216, %v133_v16  ;;  %v359_v41 = vrot.slane %v157_v29, 5 }
  0x28   : > { %v337_v42 = vadd.f32 %v315_v27, %v306_v34  ;;  %v242_v43 = vrot.slane %v212_v36, 2  ;;  %v243_v44 = vrot.slane %v213_v37, 2  ;;  %v268_v45 = vmul.f32 0.27068216, %v134_v21 }
  0x29   : > { %432 = vrot.lane.b32.xlu1 %v787_v38, %s722_s13  ;;  %v189_v46 = vsel %vm171_vm0, %v187_v35, %v188_v39  ;;  %v297_v47 = vrot.slane %v267_v40, 3  ;;  %v328_v48 = vrot.slane %v212_v36, 4  ;;  %v329_v49 = vrot.slane %v213_v37, 4 }
  0x2a   : > { %v368_v51 = vadd.f32 %v346_v31, %v337_v42  ;;  %v201_v52 = vadd.f32 %v189_v46, %v140_v28  ;;  %v244_v53 = vsel %vm226_vm1, %v242_v43, %v243_v44  ;;  %v298_v54 = vrot.slane %v268_v45, 3 }
  0x2b   : > { %v330_v56 = vsel %vm312_vm3, %v328_v48, %v329_v49  ;;  %v360_v57 = vrot.slane %v158_v33, 5  ;;  %v379_v58 = vmul.f32 0.036632847, %v134_v21  ;;  %v138_v59 = vmul.f32 0.036632847, %v129_v50 }
  0x2c   : > { %v796_v60 = vadd.f32 %v386_v32, %v368_v51  ;;  %v256_v61 = vadd.f32 %v244_v53, %v201_v52  ;;  %v299_v62 = vsel %vm281_vm2, %v297_v47, %v298_v54  ;;  %v153_v63 = vmul.f32 0.11128076, %v129_v50 }
  0x2d   : > { %v361_v1 = vsel %vm343_vm4, %v359_v41, %v360_v57  ;;  %v391_v2 = vrot.slane %v379_v58, 6  ;;  %v154_v3 = vmul.f32 0.11128076, %v130_v55  ;;  %v208_v4 = vmul.f32 0.21674532, %v129_v50 }
  0x2e   : > { %v801_v5 = vmul.f32 0.11128076, %v796_v60  ;;  %v311_v6 = vadd.f32 %v299_v62, %v256_v61  ;;  %v181_v7 = vrot.slane %v153_v63, 1  ;;  %v209_v9 = vmul.f32 0.21674532, %v130_v55 }
  0x2f   : > { %v182_v10 = vrot.slane %v154_v3, 1  ;;  %v236_v11 = vrot.slane %v208_v4, 2  ;;  %v263_v12 = vmul.f32 0.27068216, %v129_v50  ;;  %v264_v13 = vmul.f32 0.27068216, %v130_v55 }
  0x30   : > { %428 = vrot.lane.b32.xlu0 %v801_v5, %s722_s13  ;;  %v342_v14 = vadd.f32 %v330_v56, %v311_v6  ;;  %v237_v15 = vrot.slane %v209_v9, 2  ;;  %v322_v16 = vrot.slane %v208_v4, 4  ;;  %v323_v17 = vrot.slane %v209_v9, 4 }
  0x31   : > { %v183_v18 = vsel %vm171_vm0, %v181_v7, %v182_v10  ;;  %v291_v19 = vrot.slane %v263_v12, 3  ;;  %v292_v20 = vrot.slane %v264_v13, 3  ;;  %v353_v21 = vrot.slane %v153_v63, 5 }
  0x32   : > { %v373_v24 = vadd.f32 %v361_v1, %v342_v14  ;;  %v199_v25 = vadd.f32 %v183_v18, %v138_v59  ;;  %v238_v26 = vsel %vm226_vm1, %v236_v11, %v237_v15  ;;  %v324_v27 = vsel %vm312_vm3, %v322_v16, %v323_v17 }
  0x33   : > { %v293_v28 = vsel %vm281_vm2, %v291_v19, %v292_v20  ;;  %v354_v29 = vrot.slane %v154_v3, 5  ;;  %v377_v31 = vmul.f32 0.036632847, %v130_v55  ;;  %v136_v32 = vmul.f32 0.036632847, %v125_v22 }
  0x34   : > { %v811_v33 = vadd.f32 %v391_v2, %v373_v24  ;;  %v254_v34 = vadd.f32 %v238_v26, %v199_v25  ;;  %v149_v35 = vmul.f32 0.11128076, %v125_v22  ;;  %v150_v36 = vmul.f32 0.11128076, %v126_v23 }
  0x35   : > { %v355_v37 = vsel %vm343_vm4, %v353_v21, %v354_v29  ;;  %v389_v39 = vrot.slane %v377_v31, 6  ;;  %v204_v40 = vmul.f32 0.21674532, %v125_v22  ;;  %v205_v41 = vmul.f32 0.21674532, %v126_v23 }
  0x36   : > { %v815_v42 = vmul.f32 0.11128076, %v811_v33  ;;  %v309_v43 = vadd.f32 %v293_v28, %v254_v34  ;;  %v175_v44 = vrot.slane %v149_v35, 1  ;;  %v176_v45 = vrot.slane %v150_v36, 1 }
  0x37   : > { %v230_v46 = vrot.slane %v204_v40, 2  ;;  %v231_v47 = vrot.slane %v205_v41, 2  ;;  %v259_v48 = vmul.f32 0.27068216, %v125_v22  ;;  %v260_v49 = vmul.f32 0.27068216, %v126_v23 }
  0x38   : > { %438 = vrot.lane.b32.xlu2 %v815_v42, %s722_s13  ;;  %v340_v50 = vadd.f32 %v324_v27, %v309_v43  ;;  %v177_v51 = vsel %vm171_vm0, %v175_v44, %v176_v45  ;;  %v316_v52 = vrot.slane %v204_v40, 4  ;;  %v317_v53 = vrot.slane %v205_v41, 4 }
  0x39   : > { %v197_v54 = vadd.f32 %v177_v51, %v136_v32  ;;  %v232_v55 = vsel %vm226_vm1, %v230_v46, %v231_v47  ;;  %v285_v56 = vrot.slane %v259_v48, 3  ;;  %v286_v57 = vrot.slane %v260_v49, 3 }
  0x3a   : > { %v371_v58 = vadd.f32 %v355_v37, %v340_v50  ;;  %v347_v59 = vrot.slane %v149_v35, 5  ;;  %v348_v61 = vrot.slane %v150_v36, 5  ;;  %v375_v1 = vmul.f32 0.036632847, %v126_v23 }
  0x3b   : > { %v252_v62 = vadd.f32 %v232_v55, %v197_v54  ;;  %v287_v63 = vsel %vm281_vm2, %v285_v56, %v286_v57  ;;  %v318_v3 = vsel %vm312_vm3, %v316_v52, %v317_v53  ;;  %v454_v4 = vmul.f32 0.21674532, %v783_v30 }
  0x3c   : > { %v822_v2 = vadd.f32 %v389_v39, %v371_v58  ;;  %v349_v9 = vsel %vm343_vm4, %v347_v59, %v348_v61  ;;  %v387_v11 = vrot.slane %v375_v1, 6  ;;  %v457_v14 = vmul.f32 0.21674532, %v811_v33 }
  0x3d   : > { %v307_v6 = vadd.f32 %v287_v63, %v252_v62  ;;  %v452_v17 = vmul.f32 0.21674532, %v796_v60  ;;  %v456_v18 = vmul.f32 0.21674532, %v770_v0  ;;  %v490_v19 = vmul.f32 0.27068216, %v783_v30 }
  0x3e   : > { %v419_v7 = vmul.f32 0.11128076, %v822_v2  ;;  %v455_v20 = vmul.f32 0.21674532, %v822_v2  ;;  %v493_v22 = vmul.f32 0.27068216, %v811_v33 }
  0x3f   : > { %v338_v10 = vadd.f32 %v318_v3, %v307_v6  ;;  %v488_v23 = vmul.f32 0.27068216, %v796_v60  ;;  %v492_v24 = vmul.f32 0.27068216, %v770_v0  ;;  %v491_v25 = vmul.f32 0.27068216, %v822_v2 }
  0x40   : > { %434 = vrot.lane.b32.xlu1 %v419_v7, %s722_s13  ;;  %468 = vrot.lane.b32.xlu2 %v454_v4, %s723_s14  ;;  %v408_v26 = vmul.f32 0.036632847, %v770_v0  ;;  %v406_v27 = vmul.f32 0.036632847, %v783_v30  ;;  %v404_v32 = vmul.f32 0.036632847, %v796_v60 }
  0x41   : > { %v369_v12 = vadd.f32 %v349_v9, %v338_v10  ;;  %v407_v30 = vmul.f32 0.036632847, %v822_v2 }
  0x43   : > { %v399_v13 = vadd.f32 %v387_v11, %v369_v12 }
  0x45   : > { %v417_v15 = vmul.f32 0.11128076, %v399_v13  ;;  %v453_v16 = vmul.f32 0.21674532, %v399_v13  ;;  %v489_v21 = vmul.f32 0.27068216, %v399_v13 }
  0x46   : > { %v405_v31 = vmul.f32 0.036632847, %v399_v13 }
  0x47   : > { %430 = vrot.lane.b32.xlu0 %v417_v15, %s722_s13 }
  0x48   : > { %466 = vrot.lane.b32.xlu1 %v453_v16, %s723_s14  ;;  %474 = vrot.lane.b32.xlu2 %v457_v14, %s723_s14 }
  0x4f   : > { %464 = vrot.lane.b32.xlu0 %v452_v17, %s723_s14 }
  0x50   : > { %472 = vrot.lane.b32.xlu1 %v456_v18, %s723_s14  ;;  %504 = vrot.lane.b32.xlu2 %v490_v19, %s724_s15 }
  0x57   : > { %470 = vrot.lane.b32.xlu0 %v455_v20, %s723_s14 }
  0x58   : > { %502 = vrot.lane.b32.xlu1 %v489_v21, %s724_s15  ;;  %510 = vrot.lane.b32.xlu2 %v493_v22, %s724_s15 }
  0x5f   : > { %500 = vrot.lane.b32.xlu0 %v488_v23, %s724_s15 }
  0x60   : > { %508 = vrot.lane.b32.xlu1 %v492_v24, %s724_s15  ;;  %528 = vrot.lane.b32.xlu2 %v454_v4, %s725_s16 }
  0x67   : > { %506 = vrot.lane.b32.xlu0 %v491_v25, %s724_s15 }
  0x68   : > { %526 = vrot.lane.b32.xlu1 %v453_v16, %s725_s16  ;;  %534 = vrot.lane.b32.xlu2 %v457_v14, %s725_s16 }
  0x6f   : > { %524 = vrot.lane.b32.xlu0 %v452_v17, %s725_s16 }
  0x70   : > { %532 = vrot.lane.b32.xlu1 %v456_v18, %s725_s16  ;;  %552 = vrot.lane.b32.xlu2 %v787_v38, %s726_s17  ;;  %v409_v38 = vmul.f32 0.036632847, %v811_v33 }
  0x77   : > { %530 = vrot.lane.b32.xlu0 %v455_v20, %s725_s16 }
  0x78   : > { %550 = vrot.lane.b32.xlu1 %v417_v15, %s726_s17  ;;  %558 = vrot.lane.b32.xlu2 %v815_v42, %s726_s17 }
  0x7c   : > { %v437_v28 = vpop.permute.xlu2 %436 }
  0x7d   : > { %v849_v29 = vadd.f32 %v437_v28, %v408_v26 }
  0x7f   : > { %548 = vrot.lane.b32.xlu0 %v801_v5, %s726_s17 }
  0x80   : > { %556 = vrot.lane.b32.xlu1 %v773_v8, %s726_s17  ;;  %582 = vrot.lane.b32.xlu2 %v406_v27, %s727_s18 }
  0x87   : > { %554 = vrot.lane.b32.xlu0 %v419_v7, %s726_s17 }
  0x88   : > { %580 = vrot.lane.b32.xlu1 %v405_v31, %s727_s18  ;;  %588 = vrot.lane.b32.xlu2 %v409_v38, %s727_s18 }
  0x8f   : > { %578 = vrot.lane.b32.xlu0 %v404_v32, %s727_s18 }
  0x90   : > { %586 = vrot.lane.b32.xlu1 %v408_v26, %s727_s18 }
  0x92   : > { %v439_v0 = vpop.permute.xlu2 %438 }
  0x93   : > { %v451_v34 = vadd.f32 %v439_v0, %v409_v38 }
  0x97   : > { %584 = vrot.lane.b32.xlu0 %v407_v30, %s727_s18 }
  0x9a   : > { %v469_v5 = vpop.permute.xlu2 %468 }
  0x9b   : > { %v433_v37 = vpop.permute.xlu1 %432 }
  0x9c   : > { %v448_v50 = vadd.f32 %v433_v37, %v406_v27 }
  0x9e   : > { %v484_v54 = vadd.f32 %v469_v5, %v448_v50 }
  0xa2   : > { %v475_v35 = vpop.permute.xlu2 %474  ;;  %v429_v8 = vpop.permute.xlu0 %428 }
  0xa3   : > { %v446_v36 = vadd.f32 %v429_v8, %v404_v32  ;;  %v487_v56 = vadd.f32 %v475_v35, %v451_v34 }
  0xaa   : > { %v505_v39 = vpop.permute.xlu2 %504 }
  0xab   : > { %v520_v55 = vadd.f32 %v505_v39, %v484_v54 }
  0xb2   : > { %v435_v40 = vpop.permute.xlu1 %434  ;;  %v511_v33 = vpop.permute.xlu2 %510 }
  0xb3   : > { %v449_v41 = vadd.f32 %v435_v40, %v407_v30  ;;  %v523_v63 = vadd.f32 %v511_v33, %v487_v56 }
  0xb9   : > { %v431_v42 = vpop.permute.xlu0 %430 }
  0xba   : > { %v467_v43 = vpop.permute.xlu1 %466  ;;  %v529_v44 = vpop.permute.xlu2 %528  ;;  %v447_v12 = vadd.f32 %v431_v42, %v405_v31 }
  0xbb   : > { %v544_v57 = vadd.f32 %v529_v44, %v520_v55 }
  0xbc   : > { %v483_v15 = vadd.f32 %v467_v43, %v447_v12 }
  0xc1   : > { %v465_v60 = vpop.permute.xlu0 %464 }
  0xc2   : > { %v473_v45 = vpop.permute.xlu1 %472  ;;  %v535_v46 = vpop.permute.xlu2 %534  ;;  %v482_v20 = vadd.f32 %v465_v60, %v446_v36 }
  0xc3   : > { %v547_v2 = vadd.f32 %v535_v46, %v523_v63  ;;  %v486_v22 = vadd.f32 %v473_v45, %v849_v29 }
  0xc9   : > { %v471_v47 = vpop.permute.xlu0 %470 }
  0xca   : > { %v503_v48 = vpop.permute.xlu1 %502  ;;  %v553_v49 = vpop.permute.xlu2 %552  ;;  %v485_v32 = vadd.f32 %v471_v47, %v449_v41 }
  0xcb   : > { %v568_v58 = vadd.f32 %v553_v49, %v544_v57  ;;  %v519_v16 = vadd.f32 %v503_v48, %v483_v15 }
  0xd1   : > { %v501_v51 = vpop.permute.xlu0 %500 }
  0xd2   : > { %v509_v52 = vpop.permute.xlu1 %508  ;;  %v559_v53 = vpop.permute.xlu2 %558  ;;  %v518_v24 = vadd.f32 %v501_v51, %v482_v20 }
  0xd3   : > { %v571_v3 = vadd.f32 %v559_v53, %v547_v2  ;;  %v522_v25 = vadd.f32 %v509_v52, %v486_v22 }
  0xd9   : > { %v507_v59 = vpop.permute.xlu0 %506 }
  0xda   : > { %v527_v61 = vpop.permute.xlu1 %526  ;;  %v583_v62 = vpop.permute.xlu2 %582  ;;  %v521_v5 = vadd.f32 %v507_v59, %v485_v32 }
  0xdb   : > { %v598_v1 = vadd.f32 %v583_v62, %v568_v58  ;;  %v543_v17 = vadd.f32 %v527_v61, %v519_v16 }
  0xdd   : > { %612 = vrot.lane.b32.xlu2 %v598_v1, %s723_s14 }
  0xe1   : > { %v525_v4 = vpop.permute.xlu0 %524 }
  0xe2   : > { %v533_v6 = vpop.permute.xlu1 %532  ;;  %v589_v7 = vpop.permute.xlu2 %588  ;;  %v542_v26 = vadd.f32 %v525_v4, %v518_v24 }
  0xe3   : > { %v601_v9 = vadd.f32 %v589_v7, %v571_v3  ;;  %v546_v27 = vadd.f32 %v533_v6, %v522_v25 }
  0xe5   : > { %618 = vrot.lane.b32.xlu2 %v601_v9, %s723_s14 }
  0xe9   : > { %v531_v10 = vpop.permute.xlu0 %530 }
  0xea   : > { %v551_v11 = vpop.permute.xlu1 %550  ;;  %v545_v29 = vadd.f32 %v531_v10, %v521_v5 }
  0xeb   : > { %v567_v18 = vadd.f32 %v551_v11, %v543_v17 }
  0xf1   : > { %v549_v13 = vpop.permute.xlu0 %548 }
  0xf2   : > { %v557_v14 = vpop.permute.xlu1 %556  ;;  %v566_v28 = vadd.f32 %v549_v13, %v542_v26 }
  0xf3   : > { %v570_v31 = vadd.f32 %v557_v14, %v546_v27 }
  0xf9   : > { %v555_v19 = vpop.permute.xlu0 %554 }
  0xfa   : > { %v581_v21 = vpop.permute.xlu1 %580  ;;  %v569_v35 = vadd.f32 %v555_v19, %v545_v29 }
  0xfb   : > { %v597_v23 = vadd.f32 %v581_v21, %v567_v18 }
  0xfd   : > { %610 = vrot.lane.b32.xlu1 %v597_v23, %s723_s14 }
 0x101   : > { %v579_v38 = vpop.permute.xlu0 %578 }
 0x102   : > { %v596_v0 = vadd.f32 %v579_v38, %v566_v28  ;;  %v587_v30 = vpop.permute.xlu1 %586 }
 0x103   : > { %v600_v34 = vadd.f32 %v587_v30, %v570_v31 }
 0x104   : > { %608 = vrot.lane.b32.xlu0 %v596_v0, %s723_s14 }
 0x105   : > { %616 = vrot.lane.b32.xlu1 %v600_v34, %s723_s14 }
 0x109   : > { %v585_v8 = vpop.permute.xlu0 %584 }
 0x10a   : > { %v599_v36 = vadd.f32 %v585_v8, %v569_v35 }
 0x10c   : > { %614 = vrot.lane.b32.xlu0 %v599_v36, %s723_s14 }
 0x137   : > { %v613_v37 = vpop.permute.xlu2 %612 }
 0x138   : > { %629 = vst.msk [vmem:[%s121_s22 + $0xe] sm:$0xfc] %vm626_vm5, %v613_v37 }
 0x13f   : > { %v619_v39 = vpop.permute.xlu2 %618 }
 0x140   : > { %632 = vst.msk [vmem:[%s121_s22 + $0x26] sm:$0xfc] %vm626_vm5, %v619_v39 }
 0x16f   : > { %v611_v40 = vpop.permute.xlu1 %610 }
 0x170   : > { %628 = vst.msk [vmem:[%s121_s22 + $0x6] sm:$0xfc] %vm626_vm5, %v611_v40 }
 0x176   : > { %v609_v33 = vpop.permute.xlu0 %608 }
 0x177   : > { %627 = vst.msk [vmem:[%s121_s22 - $0x2] sm:$0xfc] %vm626_vm5, %v609_v33  ;;  %v617_v41 = vpop.permute.xlu1 %616 }
 0x178   : > { %631 = vst.msk [vmem:[%s121_s22 + $0x1e] sm:$0xfc] %vm626_vm5, %v617_v41 }
 0x17e   : > { %v615_v42 = vpop.permute.xlu0 %614 }
 0x17f   : > { %630 = vst.msk [vmem:[%s121_s22 + $0x16] sm:$0xfc] %vm626_vm5, %v615_v42 }
 0x180 PF: > { %s11_s6 = sadd.s32 1, %s720_s6  }
 0x181   : > { %p8_p4 = scmp.ge.s32.totalorder %s11_s6, 4  }
 0x183   :  { %10 = sbr.rel (!%p8_p4) target bundleno = 1 (0x1), region = 54 }

// kernel: custom-call.10
= control target key start
LH: loop header
LB: loop body
LE: loop exit
PB: predicated region body
PF: predicated region fallthrough
CT: control target
= control target key end

     0   :  { %s373_s6 = smov 0   ;;  %s375_s7 = smov 0   ;;  %s422_s0 = inlined_call_operand.vmem [shape: f32[2,1,3,3], index: 0, kind: input, shape index: {}]   ;;  %s423_s1 = inlined_call_operand.vmem [shape: f32[2,1,3,3], index: 1, kind: output, shape index: {}]  }
   0x1   :  { %s377_s8 = smov 0  }
   0x2 LB: > { %s299_s9 = sadd.s32 4294967295, %s360_s8   ;;  %s33_s10 = sadd.s32 1, %s356_s7  ;;  %s360_s8 = sphi %s377_s8, %s7_s8   ;;  %s356_s7 = sphi %s375_s7, %s425_s7   ;;  %s352_s6 = sphi %s373_s6, %s424_s6  }
   0x3   : > { %p35_p0 = scmp.ge.s32.totalorder %s33_s10, 2  ;;  %p301_p1 = scmp.ge.s32.totalorder %s360_s8, 2 }
   0x4   : > { %s49_s11 = sand.u32 (!%p301_p1), 1, %s360_s8   ;;  %s303_s12 = sshll.u32 (!%p301_p1), %s356_s7, 2 }
   0x5   : > { %s427_s10 = smov (%p35_p0, %s33_s10), 0  ;;  %47 = sbr.rel (%p301_p1) target bundleno = 12 (0xc), region = 16 }
   0x6   : > { %s302_s13 = sshll.u32 (!%p301_p1), %s49_s11, 2  ;;  %s56_s16 = scalar_lea.vmem (!%p301_p1), %s422_s0, %s303_s12 }
   0x7   : > { %s51_s17 = scalar_lea.vmem (!%p301_p1), [#allocation1], %s302_s13 }
   0xa   : > { %v73_v0 = vld [vmem:[%s56_s16] sm:$0xf] }
   0xb   : > { %74 = vst [vmem:[%s51_s17] sm:$0xf] %v73_v0 }
   0xc PF: > { %p304_p2 = scmp.ge.s32.totalorder %s360_s8, 1  ;;  %p91_p3 = scmp.lt.s32.totalorder %s360_s8, 3 }
   0xe   : > { %p92_p4 = pnand %p304_p2, %p91_p3 }
  0x10   : > { %95 = sbr.rel (%p92_p4) target bundleno = 437 (0x1b5), region = 50 }
  0x15   : > { %s400_s18 = sand.u32 1, %s299_s9   ;;  %v113_v1 = vlaneseq  ;;  %v362_v20 = vmov -1.0   ;;  %s308_s22 = sshll.u32 %s352_s6, 2 }
  0x16   : > { %s305_s19 = sshll.u32 %s400_s18, 2  ;;  %s206_s25 = scalar_lea.vmem %s423_s1, %s308_s22 }
  0x17   : > { %s104_s20 = scalar_lea.vmem [#allocation1], %s305_s19  ;;  %v114_v3 = vand.u32 127, %v113_v1  ;;  %v117_v4 = vshrl.u32 %v113_v1, 7  ;;  %s108_s21 = scalar_lea.vmem [#allocation3], %s305_s19 }
  0x18   : > { %v111_v2 = vld [vmem:[%s104_s20] sm:$0xf] }
  0x19   : > { %112 = vst [vmem:[#allocation0] sm:$0xf] %v111_v2  ;;  %vm119_vm0 = vcmp.eq.s32.totalorder %v117_v4, %v114_v3  ;;  %vm115_vm1 = vcmp.lt.s32.totalorder %v114_v3, 3  ;;  %vm124_vm2 = vcmp.ge.s32.totalorder %v117_v4, %v114_v3  ;;  %vm151_vm8 = vcmp.eq.s32.totalorder %v114_v3, 0 }
  0x1a   : > { %vm125_vm3 = vmand %vm124_vm2, %vm115_vm1  ;;  %vm148_vm9 = vcmp.eq.s32.totalorder %v114_v3, %v117_v4  ;;  %v152_v21 = vsel %vm151_vm8, 1.0, %v362_v20  ;;  %vm159_vm10 = vcmp.eq.s32.totalorder %v114_v3, 1  ;;  %vm169_vm11 = vcmp.eq.s32.totalorder %v114_v3, 2 }
  0x1b   : > { %v153_v22 = vsel %vm148_vm9, %v152_v21, 0.0 }
  0x20   : > { %v120_v5 = vld [vmem:[#allocation0] sm:$0xff] }
  0x21   : > { %v121_v6 = vsel %vm119_vm0, %v120_v5, 0.0  ;;  %v126_v15 = vsel %vm125_vm3, %v120_v5, 0.0 }
  0x22   : > { %122 = vadd.xlane.f32.xlu0 %v121_v6 }
  0x95   : > { %v123_v7 = vpop.xlane.xlu0 %122 }
  0x96   : > { %336 = vrcp.f32 %v123_v7  ;;  %v138_v11 = vand.u32 2147483648, %v123_v7  ;;  %v136_v13 = vand.u32 2147483647, %v123_v7  ;;  %vm132_vm5 = vweird.f32 %v123_v7 }
  0x98   : > { %v139_v16 = vor.u32 1.1754944e-38, %v138_v11  ;;  %vm137_vm7 = vcmp.eq.f32.partialorder %v136_v13, 8.507059e+37 }
  0x9c   : > { %v337_v8 = vpop.eup %336 }
  0x9d   : > { %v128_v9 = vmul.f32 %v337_v8, %v123_v7  ;;  %vm133_vm4 = vweird.f32 %v337_v8 }
  0x9e   : > { %vm134_vm6 = vmor %vm132_vm5, %vm133_vm4 }
  0x9f   : > { %v129_v10 = vsub.f32 1.0, %v128_v9 }
  0xa1   : > { %v130_v12 = vmul.f32 %v337_v8, %v129_v10 }
  0xa3   : > { %v131_v14 = vadd.f32 %v337_v8, %v130_v12 }
  0xa5   : > { %v135_v17 = vsel %vm134_vm6, %v337_v8, %v131_v14 }
  0xa6   : > { %v140_v18 = vsel %vm137_vm7, %v139_v16, %v135_v17 }
  0xa7   : > { %v141_v19 = vmul.f32 %v140_v18, %v126_v15 }
  0xa9   : > { %142 = vst [vmem:[#allocation4] sm:$0xff] %v141_v19 }
  0xb0   : > { %v155_v23 = vld [vmem:[#allocation4 + $0x1] ss:$0 sm:$0xff]  ;;  %v165_v26 = vld [vmem:[#allocation4 + $0x2] ss:$0 sm:$0xff] }
  0xb1   : > { %v156_v24 = vxor.u32 2147483648, %v155_v23  ;;  %v166_v28 = vxor.u32 2147483648, %v165_v26 }
  0xb3   : > { %v160_v25 = vmul.f32 %v156_v24, %v153_v22 }
  0xb5   : > { %161 = vadd.xlane.f32.xlu0 %v160_v25 }
 0x128   : > { %v162_v27 = vpop.xlane.xlu0 %161 }
 0x129   : > { %v163_v29 = vsel %vm159_vm10, %v162_v27, %v153_v22 }
 0x12a   : > { %v170_v30 = vmul.f32 %v166_v28, %v163_v29 }
 0x12c   : > { %171 = vadd.xlane.f32.xlu1 %v170_v30 }
 0x19f   : > { %v172_v31 = vpop.xlane.xlu1 %171 }
 0x1a0   : > { %v173_v32 = vsel %vm169_vm11, %v172_v31, %v163_v29 }
 0x1a1   : > { %v188_v33 = vmul.f32 %v173_v32, %v140_v18 }
 0x1a3   : > { %v190_v34 = vsel %vm132_vm5, %v173_v32, %v188_v33 }
 0x1a4   : > { %191 = vst [vmem:[#allocation2] sm:$0xff] %v190_v34 }
 0x1ab   : > { %v194_v35 = vld [vmem:[#allocation2] sm:$0xf] }
 0x1ac   : > { %197 = vst [vmem:[%s108_s21] sm:$0xf] %v194_v35 }
 0x1b3   : > { %v223_v36 = vld [vmem:[%s108_s21] sm:$0xf] }
 0x1b4   : > { %224 = vst [vmem:[%s206_s25] sm:$0xf] %v223_v36 }
 0x1b5 PF: > { %s7_s8 = sadd.s32 1, %s360_s8   ;;  %s424_s6 = smov %s356_s7 }
 0x1b6   : > { %p4_p5 = scmp.ge.s32.totalorder %s7_s8, 4   ;;  %s425_s7 = smov %s427_s10 }
 0x1b8   :  { %6 = sbr.rel (!%p4_p5) target bundleno = 2 (0x2), region = 112 }

// kernel: custom-call.9
= control target key start
LH: loop header
LB: loop body
LE: loop exit
PB: predicated region body
PF: predicated region fallthrough
CT: control target
= control target key end

     0   :  { %s372_s6 = smov 0   ;;  %s374_s7 = smov 0   ;;  %s421_s0 = inlined_call_operand.vmem [shape: f32[2,1,3,3], index: 0, kind: input, shape index: {}]   ;;  %s422_s1 = inlined_call_operand.vmem [shape: f32[2,1,3,3], index: 1, kind: output, shape index: {}]  }
   0x1   :  { %s376_s8 = smov 0  }
   0x2 LB: > { %s298_s9 = sadd.s32 4294967295, %s359_s8   ;;  %s33_s10 = sadd.s32 1, %s355_s7  ;;  %s359_s8 = sphi %s376_s8, %s7_s8   ;;  %s355_s7 = sphi %s374_s7, %s424_s7   ;;  %s351_s6 = sphi %s372_s6, %s423_s6  }
   0x3   : > { %p35_p0 = scmp.ge.s32.totalorder %s33_s10, 2  ;;  %p300_p1 = scmp.ge.s32.totalorder %s359_s8, 2 }
   0x4   : > { %s49_s11 = sand.u32 (!%p300_p1), 1, %s359_s8   ;;  %s302_s12 = sshll.u32 (!%p300_p1), %s355_s7, 2 }
   0x5   : > { %s426_s10 = smov (%p35_p0, %s33_s10), 0  ;;  %47 = sbr.rel (%p300_p1) target bundleno = 12 (0xc), region = 16 }
   0x6   : > { %s301_s13 = sshll.u32 (!%p300_p1), %s49_s11, 2  ;;  %s56_s16 = scalar_lea.vmem (!%p300_p1), %s421_s0, %s302_s12 }
   0x7   : > { %s51_s17 = scalar_lea.vmem (!%p300_p1), [#allocation1], %s301_s13 }
   0xa   : > { %v73_v0 = vld [vmem:[%s56_s16] sm:$0xf] }
   0xb   : > { %74 = vst [vmem:[%s51_s17] sm:$0xf] %v73_v0 }
   0xc PF: > { %p303_p2 = scmp.ge.s32.totalorder %s359_s8, 1  ;;  %p91_p3 = scmp.lt.s32.totalorder %s359_s8, 3 }
   0xe   : > { %p92_p4 = pnand %p303_p2, %p91_p3 }
  0x10   : > { %95 = sbr.rel (%p92_p4) target bundleno = 437 (0x1b5), region = 50 }
  0x15   : > { %s399_s18 = sand.u32 1, %s298_s9   ;;  %v113_v1 = vlaneseq  ;;  %v361_v20 = vmov -1.0   ;;  %s307_s22 = sshll.u32 %s351_s6, 2 }
  0x16   : > { %s304_s19 = sshll.u32 %s399_s18, 2  ;;  %s205_s25 = scalar_lea.vmem %s422_s1, %s307_s22 }
  0x17   : > { %s104_s20 = scalar_lea.vmem [#allocation1], %s304_s19  ;;  %v114_v3 = vand.u32 127, %v113_v1  ;;  %v117_v4 = vshrl.u32 %v113_v1, 7  ;;  %s108_s21 = scalar_lea.vmem [#allocation3], %s304_s19 }
  0x18   : > { %v111_v2 = vld [vmem:[%s104_s20] sm:$0xf] }
  0x19   : > { %112 = vst [vmem:[#allocation0] sm:$0xf] %v111_v2  ;;  %vm119_vm0 = vcmp.eq.s32.totalorder %v117_v4, %v114_v3  ;;  %vm115_vm1 = vcmp.lt.s32.totalorder %v114_v3, 3  ;;  %vm124_vm2 = vcmp.le.s32.totalorder %v117_v4, %v114_v3  ;;  %vm151_vm8 = vcmp.eq.s32.totalorder %v114_v3, 2 }
  0x1a   : > { %vm125_vm3 = vmand %vm124_vm2, %vm115_vm1  ;;  %vm148_vm9 = vcmp.eq.s32.totalorder %v114_v3, %v117_v4  ;;  %v152_v21 = vsel %vm151_vm8, 1.0, %v361_v20  ;;  %vm159_vm10 = vcmp.eq.s32.totalorder %v114_v3, 1  ;;  %vm168_vm11 = vcmp.eq.s32.totalorder %v114_v3, 0 }
  0x1b   : > { %v153_v22 = vsel %vm148_vm9, %v152_v21, 0.0 }
  0x20   : > { %v120_v5 = vld [vmem:[#allocation0] sm:$0xff] }
  0x21   : > { %v121_v6 = vsel %vm119_vm0, %v120_v5, 0.0  ;;  %v126_v15 = vsel %vm125_vm3, %v120_v5, 0.0 }
  0x22   : > { %122 = vadd.xlane.f32.xlu0 %v121_v6 }
  0x95   : > { %v123_v7 = vpop.xlane.xlu0 %122 }
  0x96   : > { %335 = vrcp.f32 %v123_v7  ;;  %v138_v11 = vand.u32 2147483648, %v123_v7  ;;  %v136_v13 = vand.u32 2147483647, %v123_v7  ;;  %vm132_vm5 = vweird.f32 %v123_v7 }
  0x98   : > { %v139_v16 = vor.u32 1.1754944e-38, %v138_v11  ;;  %vm137_vm7 = vcmp.eq.f32.partialorder %v136_v13, 8.507059e+37 }
  0x9c   : > { %v336_v8 = vpop.eup %335 }
  0x9d   : > { %v128_v9 = vmul.f32 %v336_v8, %v123_v7  ;;  %vm133_vm4 = vweird.f32 %v336_v8 }
  0x9e   : > { %vm134_vm6 = vmor %vm132_vm5, %vm133_vm4 }
  0x9f   : > { %v129_v10 = vsub.f32 1.0, %v128_v9 }
  0xa1   : > { %v130_v12 = vmul.f32 %v336_v8, %v129_v10 }
  0xa3   : > { %v131_v14 = vadd.f32 %v336_v8, %v130_v12 }
  0xa5   : > { %v135_v17 = vsel %vm134_vm6, %v336_v8, %v131_v14 }
  0xa6   : > { %v140_v18 = vsel %vm137_vm7, %v139_v16, %v135_v17 }
  0xa7   : > { %v141_v19 = vmul.f32 %v140_v18, %v126_v15 }
  0xa9   : > { %142 = vst [vmem:[#allocation4] sm:$0xff] %v141_v19 }
  0xb0   : > { %v155_v23 = vld [vmem:[#allocation4 + $0x1] ss:$0 sm:$0xff]  ;;  %v164_v26 = vld [vmem:[#allocation4] ss:$0 sm:$0xff] }
  0xb1   : > { %v156_v24 = vxor.u32 2147483648, %v155_v23  ;;  %v165_v28 = vxor.u32 2147483648, %v164_v26 }
  0xb3   : > { %v160_v25 = vmul.f32 %v156_v24, %v153_v22 }
  0xb5   : > { %161 = vadd.xlane.f32.xlu0 %v160_v25 }
 0x128   : > { %v162_v27 = vpop.xlane.xlu0 %161 }
 0x129   : > { %v163_v29 = vsel %vm159_vm10, %v162_v27, %v153_v22 }
 0x12a   : > { %v169_v30 = vmul.f32 %v165_v28, %v163_v29 }
 0x12c   : > { %170 = vadd.xlane.f32.xlu1 %v169_v30 }
 0x19f   : > { %v171_v31 = vpop.xlane.xlu1 %170 }
 0x1a0   : > { %v172_v32 = vsel %vm168_vm11, %v171_v31, %v163_v29 }
 0x1a1   : > { %v187_v33 = vmul.f32 %v172_v32, %v140_v18 }
 0x1a3   : > { %v189_v34 = vsel %vm132_vm5, %v172_v32, %v187_v33 }
 0x1a4   : > { %190 = vst [vmem:[#allocation2] sm:$0xff] %v189_v34 }
 0x1ab   : > { %v193_v35 = vld [vmem:[#allocation2] sm:$0xf] }
 0x1ac   : > { %196 = vst [vmem:[%s108_s21] sm:$0xf] %v193_v35 }
 0x1b3   : > { %v222_v36 = vld [vmem:[%s108_s21] sm:$0xf] }
 0x1b4   : > { %223 = vst [vmem:[%s205_s25] sm:$0xf] %v222_v36 }
 0x1b5 PF: > { %s7_s8 = sadd.s32 1, %s359_s8   ;;  %s423_s6 = smov %s355_s7 }
 0x1b6   : > { %p4_p5 = scmp.ge.s32.totalorder %s7_s8, 4   ;;  %s424_s7 = smov %s426_s10 }
 0x1b8   :  { %6 = sbr.rel (!%p4_p5) target bundleno = 2 (0x2), region = 111 }

// kernel: _lambda_.6
= control target key start
LH: loop header
LB: loop body
LE: loop exit
PB: predicated region body
PF: predicated region fallthrough
CT: control target
= control target key end

     0   :  { %7 = vsyncpa [#allocation3], 0  ;;  %s381_s9 = smov 0   ;;  %s413_s0 = inlined_call_operand.vmem [shape: f32[2,6,36], index: 0, kind: input, shape index: {}]   ;;  %s414_s1 = inlined_call_operand.vmem [shape: f32[2,3,3], index: 1, kind: input, shape index: {}]   ;;  %s415_s2 = inlined_call_operand.vmem [shape: f32[2,1,36], index: 2, kind: output, shape index: {}]  }
   0x1 LB: > { %s292_s10 = sadd.s32 4294967295, %s361_s9   ;;  %p294_p0 = scmp.ge.s32.totalorder %s361_s9, 1  ;;  %s361_s9 = sphi %s381_s9, %s13_s9  }
   0x2   : > { %p91_p1 = scmp.lt.s32.totalorder %s361_s9, 3  ;;  %s102_s13 = sshll.u32 %s414_s1, 4  ;;  %s103_s13 = int_to_ptr.vmem [resolvable:$true] %s102_s13 }
   0x3   : > { %p321_p3 = scmp.eq.s32.totalorder %s292_s10, 0  ;;  %s363_s14 = smov [#allocation2]  }
   0x4   : > { %p92_p2 = pnand %p294_p0, %p91_p1  ;;  %s364_s15 = smov 64  }
   0x5   : > { %s365_s16 = smov 4  }
   0x6   : > { %p317_p4 = pneg %p92_p2  ;;  %125 = sbr.rel (%p92_p2) target bundleno = 67 (0x43), region = 28 }
   0x8   : > { %p318_p5 = pnand %p321_p3, %p317_p4 }
   0xa   : > { %320 = dma.vmem_to_smem (!%p318_p5), %s103_s13, 128, %s363_s14, [#allocation3], %s364_s15, %s364_s15, %s365_s16  }
   0xb   : > { %356 = dma.done.wait (%p321_p3), [#allocation3], 128  }
   0xc   : > { %358 = vsyncadd (%p321_p3), [#allocation3], 4294967168 }
   0xd   : > { %132 = sfence }
   0xe   : > { %p146_p6 = scmp.lt.s32.totalorder %s292_s10, 1  ;;  %s306_s17 = sshll.u32 %s292_s10, 9  ;;  %vm231_vm2 = vcmask 286720  }
   0xf   : > { %s155_s18 = sld [smem:[#allocation2 + %s306_s17]]  ;;  %s308_s19 = sadd.s32 128, %s306_s17 }
  0x10   : > { %s417_s10 = smov (!%p146_p6, %s292_s10), 1  ;;  %s162_s20 = sld [smem:[#allocation2 + %s308_s19]] }
  0x11   : > { %s310_s21 = sadd.s32 256, %s306_s17  ;;  %s299_s22 = sshll.u32 %s417_s10, 3 }
  0x12   : > { %s398_s25 = scalar_lea.vmem %s413_s0, %s299_s22  ;;  %s169_s26 = sld [smem:[#allocation2 + %s310_s21]] }
  0x13   : > { %v156_v0 = vld [vmem:[%s398_s25] sm:$0x1]  ;;  %v163_v2 = vld [vmem:[%s398_s25 + $0x1] sm:$0x1]  ;;  %s179_s27 = sadd.s32 1, %s306_s17  ;;  %s184_s28 = sadd.s32 1, %s308_s19 }
  0x14   : > { %s180_s29 = sld [smem:[#allocation2 + %s179_s27]]  ;;  %s189_s30 = sadd.s32 1, %s310_s21  ;;  %v170_v5 = vld [vmem:[%s398_s25 + $0x2] sm:$0x1]  ;;  %v174_v10 = vld [vmem:[%s398_s25 + $0x3] sm:$0x1] }
  0x15   : > { %v157_v1 = vstv %s155_s18  ;;  %s185_s3 = sld [smem:[#allocation2 + %s184_s28]]  ;;  %s199_s4 = sadd.s32 2, %s306_s17  ;;  %v194_v23 = vld [vmem:[%s398_s25 + $0x4] sm:$0x1]  ;;  %v214_v31 = vld [vmem:[%s398_s25 + $0x5] sm:$0x1] }
  0x16   : > { %v158_v3 = vmul.f32 %v157_v1, %v156_v0  ;;  %v164_v4 = vstv %s162_s20  ;;  %s190_s5 = sld [smem:[#allocation2 + %s189_s30]]  ;;  %s204_s6 = sadd.s32 2, %s308_s19 }
  0x17   : > { %v165_v6 = vmul.f32 %v164_v4, %v163_v2  ;;  %s200_s7 = sld [smem:[#allocation2 + %s199_s4]]  ;;  %s209_s8 = sadd.s32 2, %s310_s21 }
  0x18   : > { %v171_v7 = vstv %s169_s26  ;;  %s205_s11 = sld [smem:[#allocation2 + %s204_s6]]  ;;  %s152_s15 = scalar_lea.vmem %s415_s2, %s417_s10 }
  0x19   : > { %v166_v8 = vadd.f32 %v165_v6, %v158_v3  ;;  %v172_v9 = vmul.f32 %v171_v7, %v170_v5  ;;  %s210_s12 = sld [smem:[#allocation2 + %s209_s8]] }
  0x1a   : > { %v181_v12 = vstv %s180_s29 }
  0x1b   : > { %v173_v11 = vadd.f32 %v172_v9, %v166_v8  ;;  %v182_v13 = vmul.f32 %v181_v12, %v156_v0  ;;  %v186_v14 = vstv %s185_s3 }
  0x1c   : > { %v187_v16 = vmul.f32 %v186_v14, %v163_v2  ;;  %v191_v17 = vstv %s190_s5 }
  0x1d   : > { %v175_v15 = vsub.f32 %v173_v11, %v174_v10  ;;  %v192_v18 = vmul.f32 %v191_v17, %v170_v5  ;;  %v201_v19 = vstv %s200_s7 }
  0x1e   : > { %v188_v20 = vadd.f32 %v187_v16, %v182_v13  ;;  %v202_v21 = vmul.f32 %v201_v19, %v156_v0  ;;  %v206_v22 = vstv %s205_s11 }
  0x1f   : > { %v207_v24 = vmul.f32 %v206_v22, %v163_v2  ;;  %v211_v25 = vstv %s210_s12  ;;  %v176_v26 = vmul.f32 255.0, %v175_v15 }
  0x20   : > { %v193_v27 = vadd.f32 %v192_v18, %v188_v20  ;;  %v212_v28 = vmul.f32 %v211_v25, %v170_v5 }
  0x21   : > { %v208_v29 = vadd.f32 %v207_v24, %v202_v21  ;;  %v177_v33 = vmul.f32 %v176_v26, %v176_v26 }
  0x22   : > { %v195_v30 = vsub.f32 %v193_v27, %v194_v23 }
  0x23   : > { %v213_v32 = vadd.f32 %v212_v28, %v208_v29 }
  0x24   : > { %v196_v34 = vmul.f32 255.0, %v195_v30 }
  0x25   : > { %v215_v35 = vsub.f32 %v213_v32, %v214_v31 }
  0x26   : > { %v197_v36 = vmul.f32 %v196_v34, %v196_v34 }
  0x27   : > { %v216_v37 = vmul.f32 255.0, %v215_v35 }
  0x28   : > { %v198_v38 = vadd.f32 %v197_v36, %v177_v33 }
  0x29   : > { %v217_v39 = vmul.f32 %v216_v37, %v216_v37 }
  0x2b   : > { %v218_v40 = vadd.f32 %v217_v39, %v198_v38 }
  0x2d   : > { %334 = vrsqrt.f32 %v218_v40  ;;  %vm226_vm0 = vcmp.eq.f32.partialorder %v218_v40, inf  ;;  %v229_v47 = vand.u32 2147483648, %v218_v40  ;;  %vm228_vm1 = vcmp.eq.f32.partialorder %v218_v40, 0.0 }
  0x33   : > { %v335_v41 = vpop.eup %334 }
  0x34   : > { %v220_v42 = vmul.f32 %v335_v41, %v218_v40 }
  0x36   : > { %v221_v43 = vmul.f32 %v335_v41, %v220_v42 }
  0x38   : > { %v222_v44 = vmul.f32 0.5, %v221_v43 }
  0x3a   : > { %v223_v45 = vsub.f32 1.5, %v222_v44 }
  0x3c   : > { %v224_v46 = vmul.f32 %v335_v41, %v223_v45 }
  0x3e   : > { %v225_v48 = vmul.f32 %v224_v46, %v218_v40 }
  0x40   : > { %v227_v49 = vsel %vm226_vm0, %v218_v40, %v225_v48 }
  0x41   : > { %v230_v50 = vsel %vm228_vm1, %v229_v47, %v227_v49 }
  0x42   : > { %232 = vst.msk [vmem:[%s152_s15] sm:$0x1] %vm231_vm2, %v230_v50 }
  0x43 PF: > { %s13_s9 = sadd.s32 1, %s361_s9  }
  0x44   : > { %p10_p7 = scmp.ge.s32.totalorder %s13_s9, 4  }
  0x46   :  { %12 = sbr.rel (!%p10_p7) target bundleno = 1 (0x1), region = 63 }
  0x4b   :  { %250 = vsyncpa [#allocation3], 1 }
  0x4c   :  { %252 = vsyncpa [#allocation3 + $0x1], 1 }

// kernel: _lambda_.7
= control target key start
LH: loop header
LB: loop body
LE: loop exit
PB: predicated region body
PF: predicated region fallthrough
CT: control target
= control target key end

     0   :  { %7 = vsyncpa [#allocation3], 0  ;;  %s1166_s9 = smov 0   ;;  %s1168_s10 = smov 0   ;;  %s1607_s0 = inlined_call_operand.vmem [shape: f32[2,3,16384], index: 0, kind: input, shape index: {}]   ;;  %s1608_s1 = inlined_call_operand.vmem [shape: f32[2,3,3], index: 1, kind: input, shape index: {}]   ;;  %s1609_s2 = inlined_call_operand.vmem [shape: f32[2,3,16384], index: 2, kind: output, shape index: {}]  }
   0x1   :  { %s1170_s11 = smov 0  }
   0x2 LB: > { %s854_s12 = sadd.s32 4294967295, %s1146_s11   ;;  %s25_s13 = sadd.s32 1, %s1142_s10  ;;  %s1146_s11 = sphi %s1170_s11, %s13_s11   ;;  %s1142_s10 = sphi %s1168_s10, %s1611_s10   ;;  %s1138_s9 = sphi %s1166_s9, %s1610_s9  }
   0x3   : > { %p27_p0 = scmp.ge.s32.totalorder %s25_s13, 2  ;;  %p856_p1 = scmp.ge.s32.totalorder %s1146_s11, 1 }
   0x4   : > { %p107_p2 = scmp.lt.s32.totalorder %s1146_s11, 3  ;;  %p1076_p4 = scmp.eq.s32.totalorder %s854_s12, 0 }
   0x5   : > { %s1613_s13 = smov (%p27_p0, %s25_s13), 0  ;;  %s118_s16 = sshll.u32 %s1608_s1, 4  ;;  %s119_s16 = int_to_ptr.vmem [resolvable:$true] %s118_s16 }
   0x6   : > { %p108_p3 = pnand %p856_p1, %p107_p2  ;;  %s1148_s17 = smov [#allocation2]  }
   0x7   : > { %s1149_s18 = smov 64   ;;  %s1150_s19 = smov 4  }
   0x8   : > { %p1072_p5 = pneg %p108_p3  ;;  %147 = sbr.rel (%p108_p3) target bundleno = 94 (0x5e), region = 28 }
   0xa   : > { %p1073_p6 = pnand %p1076_p4, %p1072_p5 }
   0xc   : > { %1075 = dma.vmem_to_smem (!%p1073_p6), %s119_s16, 128, %s1148_s17, [#allocation3], %s1149_s18, %s1149_s18, %s1150_s19  }
   0xd   : > { %1133 = dma.done.wait (%p1076_p4), [#allocation3], 128  }
   0xe   : > { %1135 = vsyncadd (%p1076_p4), [#allocation3], 4294967168 }
   0xf   : > { %154 = sfence }
  0x10   : > { %p180_p7 = scmp.lt.s32.totalorder %s1138_s9, 1  ;;  %s1188_s20 = sshll.u32 %s1138_s9, 9 }
  0x11   : > { %s201_s21 = sld [smem:[#allocation2 + %s1188_s20]]  ;;  %s1192_s22 = sadd.s32 128, %s1188_s20 }
  0x12   : > { %s1615_s9 = smov (!%p180_p7, %s1138_s9), 1  ;;  %s252_s23 = sld [smem:[#allocation2 + %s1192_s22]] }
  0x13   : > { %s1198_s24 = sadd.s32 256, %s1188_s20  ;;  %s1059_s25 = sshll.u32 %s1615_s9, 9 }
  0x14   : > { %s320_s26 = sld [smem:[#allocation2 + %s1198_s24]]  ;;  %s1207_s29 = scalar_lea.vmem %s1607_s0, %s1059_s25 }
  0x15   : > { %v202_v0 = vld [vmem:[%s1207_s29] ss:$4 sm:$0xff]  ;;  %v883_v1 = vld [vmem:[%s1207_s29 + $0x1] ss:$4 sm:$0xff]  ;;  %v900_v2 = vld [vmem:[%s1207_s29 + $0x2] ss:$4 sm:$0xff]  ;;  %s1252_s4 = scalar_lea.vmem %s1609_s2, %s1059_s25 }
  0x16   : > { %v867_v4 = vld [vmem:[%s1207_s29 + $0x20] ss:$4 sm:$0xff]  ;;  %v884_v5 = vld [vmem:[%s1207_s29 + $0x21] ss:$4 sm:$0xff]  ;;  %v901_v6 = vld [vmem:[%s1207_s29 + $0x22] ss:$4 sm:$0xff] }
  0x17   : > { %v1212_v3 = vstv %s201_s21  ;;  %v868_v9 = vld [vmem:[%s1207_s29 + $0x40] ss:$4 sm:$0xff]  ;;  %v885_v10 = vld [vmem:[%s1207_s29 + $0x41] ss:$4 sm:$0xff]  ;;  %v902_v11 = vld [vmem:[%s1207_s29 + $0x42] ss:$4 sm:$0xff] }
  0x18   : > { %v234_v7 = vmul.f32 %v1212_v3, %v202_v0  ;;  %v235_v8 = vmul.f32 %v867_v4, %v1212_v3  ;;  %v1222_v12 = vstv %s252_s23  ;;  %v236_v13 = vmul.f32 %v868_v9, %v1212_v3  ;;  %v869_v14 = vld [vmem:[%s1207_s29 + $0x60] ss:$4 sm:$0xff]  ;;  %v886_v15 = vld [vmem:[%s1207_s29 + $0x61] ss:$4 sm:$0xff]  ;;  %v903_v16 = vld [vmem:[%s1207_s29 + $0x62] ss:$4 sm:$0xff] }
  0x19   : > { %v286_v17 = vmul.f32 %v883_v1, %v1222_v12  ;;  %v287_v19 = vmul.f32 %v884_v5, %v1222_v12  ;;  %v288_v20 = vmul.f32 %v885_v10, %v1222_v12  ;;  %v870_v21 = vld [vmem:[%s1207_s29 + $0x80] ss:$4 sm:$0xff]  ;;  %v887_v22 = vld [vmem:[%s1207_s29 + $0x81] ss:$4 sm:$0xff]  ;;  %v904_v23 = vld [vmem:[%s1207_s29 + $0x82] ss:$4 sm:$0xff]  ;;  %v237_v27 = vmul.f32 %v869_v14, %v1212_v3 }
  0x1a   : > { %v1229_v18 = vstv %s320_s26  ;;  %v871_v28 = vld [vmem:[%s1207_s29 + $0xa0] ss:$4 sm:$0xff]  ;;  %v888_v29 = vld [vmem:[%s1207_s29 + $0xa1] ss:$4 sm:$0xff]  ;;  %v905_v30 = vld [vmem:[%s1207_s29 + $0xa2] ss:$4 sm:$0xff]  ;;  %v289_v34 = vmul.f32 %v886_v15, %v1222_v12  ;;  %v238_v39 = vmul.f32 %v870_v21, %v1212_v3  ;;  %v290_v40 = vmul.f32 %v887_v22, %v1222_v12 }
  0x1b   : > { %v354_v24 = vmul.f32 %v900_v2, %v1229_v18  ;;  %v355_v25 = vmul.f32 %v901_v6, %v1229_v18  ;;  %v356_v26 = vmul.f32 %v902_v11, %v1229_v18  ;;  %v302_v31 = vadd.f32 %v286_v17, %v234_v7  ;;  %v872_v35 = vld [vmem:[%s1207_s29 + $0xc0] ss:$4 sm:$0xff]  ;;  %v889_v36 = vld [vmem:[%s1207_s29 + $0xc1] ss:$4 sm:$0xff]  ;;  %v906_v37 = vld [vmem:[%s1207_s29 + $0xc2] ss:$4 sm:$0xff] }
  0x1c   : > { %v303_v32 = vadd.f32 %v287_v19, %v235_v8  ;;  %v304_v33 = vadd.f32 %v288_v20, %v236_v13  ;;  %v357_v38 = vmul.f32 %v903_v16, %v1229_v18  ;;  %v358_v41 = vmul.f32 %v904_v23, %v1229_v18  ;;  %v873_v42 = vld [vmem:[%s1207_s29 + $0xe0] ss:$4 sm:$0xff]  ;;  %v890_v43 = vld [vmem:[%s1207_s29 + $0xe1] ss:$4 sm:$0xff]  ;;  %v907_v44 = vld [vmem:[%s1207_s29 + $0xe2] ss:$4 sm:$0xff] }
  0x1d   : > { %v370_v45 = vadd.f32 %v354_v24, %v302_v31  ;;  %v305_v48 = vadd.f32 %v289_v34, %v237_v27  ;;  %v874_v49 = vld [vmem:[%s1207_s29 + $0x100] ss:$4 sm:$0xff]  ;;  %v891_v50 = vld [vmem:[%s1207_s29 + $0x101] ss:$4 sm:$0xff]  ;;  %v908_v51 = vld [vmem:[%s1207_s29 + $0x102] ss:$4 sm:$0xff]  ;;  %v306_v52 = vadd.f32 %v290_v40, %v238_v39  ;;  %v239_v53 = vmul.f32 %v871_v28, %v1212_v3 }
  0x1e   : > { %v371_v46 = vadd.f32 %v355_v25, %v303_v32  ;;  %v372_v47 = vadd.f32 %v356_v26, %v304_v33  ;;  %v291_v54 = vmul.f32 %v888_v29, %v1222_v12  ;;  %v359_v55 = vmul.f32 %v905_v30, %v1229_v18  ;;  %v875_v56 = vld [vmem:[%s1207_s29 + $0x120] ss:$4 sm:$0xff]  ;;  %v892_v57 = vld [vmem:[%s1207_s29 + $0x121] ss:$4 sm:$0xff]  ;;  %v909_v58 = vld [vmem:[%s1207_s29 + $0x122] ss:$4 sm:$0xff] }
  0x1f   : > { %386 = vst [vmem:[%s1252_s4] ss:$4 sm:$0xff] %v370_v45  ;;  %v373_v59 = vadd.f32 %v357_v38, %v305_v48  ;;  %v240_v60 = vmul.f32 %v872_v35, %v1212_v3  ;;  %v292_v61 = vmul.f32 %v889_v36, %v1222_v12  ;;  %v360_v62 = vmul.f32 %v906_v37, %v1229_v18  ;;  %v876_v63 = vld [vmem:[%s1207_s29 + $0x140] ss:$4 sm:$0xff]  ;;  %v893_v0 = vld [vmem:[%s1207_s29 + $0x141] ss:$4 sm:$0xff]  ;;  %s417_s5 = sadd.s32 1, %s1188_s20 }
  0x20   : > { %916 = vst [vmem:[%s1252_s4 + $0x20] ss:$4 sm:$0xff] %v371_v46  ;;  %v374_v1 = vadd.f32 %v358_v41, %v306_v52  ;;  %v307_v2 = vadd.f32 %v291_v54, %v239_v53  ;;  %v241_v4 = vmul.f32 %v873_v42, %v1212_v3  ;;  %v293_v5 = vmul.f32 %v890_v43, %v1222_v12  ;;  %v910_v6 = vld [vmem:[%s1207_s29 + $0x142] ss:$4 sm:$0xff]  ;;  %v877_v11 = vld [vmem:[%s1207_s29 + $0x160] ss:$4 sm:$0xff] }
  0x21   : > { %917 = vst [vmem:[%s1252_s4 + $0x40] ss:$4 sm:$0xff] %v372_v47  ;;  %v308_v7 = vadd.f32 %v292_v61, %v240_v60  ;;  %v361_v8 = vmul.f32 %v907_v44, %v1229_v18  ;;  %v242_v9 = vmul.f32 %v874_v49, %v1212_v3  ;;  %v294_v10 = vmul.f32 %v891_v50, %v1222_v12  ;;  %v894_v13 = vld [vmem:[%s1207_s29 + $0x161] ss:$4 sm:$0xff]  ;;  %v911_v19 = vld [vmem:[%s1207_s29 + $0x162] ss:$4 sm:$0xff] }
  0x22   : > { %918 = vst [vmem:[%s1252_s4 + $0x60] ss:$4 sm:$0xff] %v373_v59  ;;  %v375_v14 = vadd.f32 %v359_v55, %v307_v2  ;;  %v309_v15 = vadd.f32 %v293_v5, %v241_v4  ;;  %v362_v16 = vmul.f32 %v908_v51, %v1229_v18  ;;  %v243_v17 = vmul.f32 %v875_v56, %v1212_v3  ;;  %v878_v20 = vld [vmem:[%s1207_s29 + $0x180] ss:$4 sm:$0xff]  ;;  %v895_v25 = vld [vmem:[%s1207_s29 + $0x181] ss:$4 sm:$0xff] }
  0x23   : > { %919 = vst [vmem:[%s1252_s4 + $0x80] ss:$4 sm:$0xff] %v374_v1  ;;  %v376_v21 = vadd.f32 %v360_v62, %v308_v7  ;;  %v310_v22 = vadd.f32 %v294_v10, %v242_v9  ;;  %v295_v23 = vmul.f32 %v892_v57, %v1222_v12  ;;  %v363_v24 = vmul.f32 %v909_v58, %v1229_v18  ;;  %v912_v26 = vld [vmem:[%s1207_s29 + $0x182] ss:$4 sm:$0xff]  ;;  %v879_v31 = vld [vmem:[%s1207_s29 + $0x1a0] ss:$4 sm:$0xff] }
  0x24   : > { %920 = vst [vmem:[%s1252_s4 + $0xa0] ss:$4 sm:$0xff] %v375_v14  ;;  %v377_v27 = vadd.f32 %v361_v8, %v309_v15  ;;  %v244_v28 = vmul.f32 %v876_v63, %v1212_v3  ;;  %v296_v29 = vmul.f32 %v893_v0, %v1222_v12  ;;  %v364_v30 = vmul.f32 %v910_v6, %v1229_v18  ;;  %v896_v32 = vld [vmem:[%s1207_s29 + $0x1a1] ss:$4 sm:$0xff]  ;;  %v913_v37 = vld [vmem:[%s1207_s29 + $0x1a2] ss:$4 sm:$0xff] }
  0x25   : > { %921 = vst [vmem:[%s1252_s4 + $0xc0] ss:$4 sm:$0xff] %v376_v21  ;;  %v378_v33 = vadd.f32 %v362_v16, %v310_v22  ;;  %v311_v34 = vadd.f32 %v295_v23, %v243_v17  ;;  %v245_v35 = vmul.f32 %v877_v11, %v1212_v3  ;;  %v297_v36 = vmul.f32 %v894_v13, %v1222_v12  ;;  %v880_v38 = vld [vmem:[%s1207_s29 + $0x1c0] ss:$4 sm:$0xff]  ;;  %v897_v43 = vld [vmem:[%s1207_s29 + $0x1c1] ss:$4 sm:$0xff] }
  0x26   : > { %922 = vst [vmem:[%s1252_s4 + $0xe0] ss:$4 sm:$0xff] %v377_v27  ;;  %v312_v39 = vadd.f32 %v296_v29, %v244_v28  ;;  %v365_v40 = vmul.f32 %v911_v19, %v1229_v18  ;;  %v246_v41 = vmul.f32 %v878_v20, %v1212_v3  ;;  %v298_v42 = vmul.f32 %v895_v25, %v1222_v12  ;;  %v914_v44 = vld [vmem:[%s1207_s29 + $0x1c2] ss:$4 sm:$0xff]  ;;  %v881_v49 = vld [vmem:[%s1207_s29 + $0x1e0] ss:$4 sm:$0xff] }
  0x27   : > { %923 = vst [vmem:[%s1252_s4 + $0x100] ss:$4 sm:$0xff] %v378_v33  ;;  %v379_v45 = vadd.f32 %v363_v24, %v311_v34  ;;  %v313_v46 = vadd.f32 %v297_v36, %v245_v35  ;;  %v366_v47 = vmul.f32 %v912_v26, %v1229_v18  ;;  %v247_v48 = vmul.f32 %v879_v31, %v1212_v3  ;;  %v898_v50 = vld [vmem:[%s1207_s29 + $0x1e1] ss:$4 sm:$0xff]  ;;  %v915_v55 = vld [vmem:[%s1207_s29 + $0x1e2] ss:$4 sm:$0xff] }
  0x28   : > { %v380_v51 = vadd.f32 %v364_v30, %v312_v39  ;;  %v314_v52 = vadd.f32 %v298_v42, %v246_v41  ;;  %v299_v53 = vmul.f32 %v896_v32, %v1222_v12  ;;  %v367_v54 = vmul.f32 %v913_v37, %v1229_v18  ;;  %s1324_s6 = sld [smem:[#allocation2 + %s417_s5]]  ;;  %s452_s7 = sadd.s32 1, %s1192_s22  ;;  %v419_v0 = vld [vmem:[%s1207_s29] ss:$4 sm:$0xff]  ;;  %v946_v4 = vld [vmem:[%s1207_s29 + $0x1] ss:$4 sm:$0xff] }
  0x29   : > { %924 = vst [vmem:[%s1252_s4 + $0x120] ss:$4 sm:$0xff] %v379_v45  ;;  %v381_v56 = vadd.f32 %v365_v40, %v313_v46  ;;  %v248_v57 = vmul.f32 %v880_v38, %v1212_v3  ;;  %v300_v58 = vmul.f32 %v897_v43, %v1222_v12  ;;  %v368_v59 = vmul.f32 %v914_v44, %v1229_v18  ;;  %s1331_s8 = sld [smem:[#allocation2 + %s452_s7]]  ;;  %s503_s9 = sadd.s32 1, %s1198_s24  ;;  %v931_v5 = vld [vmem:[%s1207_s29 + $0x20] ss:$4 sm:$0xff] }
  0x2a   : > { %925 = vst [vmem:[%s1252_s4 + $0x140] ss:$4 sm:$0xff] %v380_v51  ;;  %v382_v60 = vadd.f32 %v366_v47, %v314_v52  ;;  %v315_v61 = vadd.f32 %v299_v53, %v247_v48  ;;  %v249_v62 = vmul.f32 %v881_v49, %v1212_v3  ;;  %v301_v63 = vmul.f32 %v898_v50, %v1222_v12  ;;  %s1338_s12 = sld [smem:[#allocation2 + %s503_s9]]  ;;  %s586_s14 = sadd.s32 2, %s1188_s20  ;;  %v962_v6 = vld [vmem:[%s1207_s29 + $0x2] ss:$4 sm:$0xff] }
  0x2b   : > { %926 = vst [vmem:[%s1252_s4 + $0x160] ss:$4 sm:$0xff] %v381_v56  ;;  %v316_v1 = vadd.f32 %v300_v58, %v248_v57  ;;  %v369_v2 = vmul.f32 %v915_v55, %v1229_v18  ;;  %v947_v7 = vld [vmem:[%s1207_s29 + $0x21] ss:$4 sm:$0xff]  ;;  %v932_v8 = vld [vmem:[%s1207_s29 + $0x40] ss:$4 sm:$0xff] }
  0x2c   : > { %927 = vst [vmem:[%s1252_s4 + $0x180] ss:$4 sm:$0xff] %v382_v60  ;;  %v383_v3 = vadd.f32 %v367_v54, %v315_v61  ;;  %v317_v12 = vadd.f32 %v301_v63, %v249_v62  ;;  %v963_v10 = vld [vmem:[%s1207_s29 + $0x22] ss:$4 sm:$0xff]  ;;  %v948_v18 = vld [vmem:[%s1207_s29 + $0x41] ss:$4 sm:$0xff] }
  0x2d   : > { %v384_v9 = vadd.f32 %v368_v59, %v316_v1  ;;  %v964_v11 = vld [vmem:[%s1207_s29 + $0x42] ss:$4 sm:$0xff]  ;;  %v933_v15 = vld [vmem:[%s1207_s29 + $0x60] ss:$4 sm:$0xff]  ;;  %v949_v16 = vld [vmem:[%s1207_s29 + $0x61] ss:$4 sm:$0xff] }
  0x2e   : > { %928 = vst [vmem:[%s1252_s4 + $0x1a0] ss:$4 sm:$0xff] %v383_v3  ;;  %v385_v13 = vadd.f32 %v369_v2, %v317_v12  ;;  %v1354_v14 = vstv %s1324_s6  ;;  %v965_v22 = vld [vmem:[%s1207_s29 + $0x62] ss:$4 sm:$0xff]  ;;  %v934_v23 = vld [vmem:[%s1207_s29 + $0x80] ss:$4 sm:$0xff] }
  0x2f   : > { %929 = vst [vmem:[%s1252_s4 + $0x1c0] ss:$4 sm:$0xff] %v384_v9  ;;  %v436_v17 = vmul.f32 %v1354_v14, %v419_v0  ;;  %v1361_v19 = vstv %s1331_s8  ;;  %v437_v20 = vmul.f32 %v931_v5, %v1354_v14  ;;  %v438_v21 = vmul.f32 %v932_v8, %v1354_v14  ;;  %v950_v28 = vld [vmem:[%s1207_s29 + $0x81] ss:$4 sm:$0xff]  ;;  %v966_v29 = vld [vmem:[%s1207_s29 + $0x82] ss:$4 sm:$0xff] }
  0x30   : > { %930 = vst [vmem:[%s1252_s4 + $0x1e0] ss:$4 sm:$0xff] %v385_v13  ;;  %v471_v24 = vmul.f32 %v946_v4, %v1361_v19  ;;  %v1370_v25 = vstv %s1338_s12  ;;  %v472_v26 = vmul.f32 %v947_v7, %v1361_v19  ;;  %v473_v27 = vmul.f32 %v948_v18, %v1361_v19  ;;  %v935_v34 = vld [vmem:[%s1207_s29 + $0xa0] ss:$4 sm:$0xff]  ;;  %v951_v35 = vld [vmem:[%s1207_s29 + $0xa1] ss:$4 sm:$0xff] }
  0x31   : > { %v522_v30 = vmul.f32 %v962_v6, %v1370_v25  ;;  %v523_v31 = vmul.f32 %v963_v10, %v1370_v25  ;;  %v524_v32 = vmul.f32 %v964_v11, %v1370_v25  ;;  %v439_v33 = vmul.f32 %v933_v15, %v1354_v14  ;;  %v967_v36 = vld [vmem:[%s1207_s29 + $0xa2] ss:$4 sm:$0xff]  ;;  %v936_v41 = vld [vmem:[%s1207_s29 + $0xc0] ss:$4 sm:$0xff]  ;;  %v952_v42 = vld [vmem:[%s1207_s29 + $0xc1] ss:$4 sm:$0xff] }
  0x32   : > { %v487_v37 = vadd.f32 %v471_v24, %v436_v17  ;;  %v488_v38 = vadd.f32 %v472_v26, %v437_v20  ;;  %v489_v39 = vadd.f32 %v473_v27, %v438_v21  ;;  %v474_v40 = vmul.f32 %v949_v16, %v1361_v19  ;;  %v968_v43 = vld [vmem:[%s1207_s29 + $0xc2] ss:$4 sm:$0xff]  ;;  %v937_v48 = vld [vmem:[%s1207_s29 + $0xe0] ss:$4 sm:$0xff]  ;;  %v953_v49 = vld [vmem:[%s1207_s29 + $0xe1] ss:$4 sm:$0xff] }
  0x33   : > { %v525_v44 = vmul.f32 %v965_v22, %v1370_v25  ;;  %v440_v45 = vmul.f32 %v934_v23, %v1354_v14  ;;  %v475_v46 = vmul.f32 %v950_v28, %v1361_v19  ;;  %v526_v47 = vmul.f32 %v966_v29, %v1370_v25  ;;  %v969_v50 = vld [vmem:[%s1207_s29 + $0xe2] ss:$4 sm:$0xff]  ;;  %v938_v55 = vld [vmem:[%s1207_s29 + $0x100] ss:$4 sm:$0xff]  ;;  %v954_v56 = vld [vmem:[%s1207_s29 + $0x101] ss:$4 sm:$0xff] }
  0x34   : > { %v538_v51 = vadd.f32 %v522_v30, %v487_v37  ;;  %v539_v52 = vadd.f32 %v523_v31, %v488_v38  ;;  %v540_v53 = vadd.f32 %v524_v32, %v489_v39  ;;  %v490_v54 = vadd.f32 %v474_v40, %v439_v33  ;;  %v970_v57 = vld [vmem:[%s1207_s29 + $0x102] ss:$4 sm:$0xff]  ;;  %v939_v62 = vld [vmem:[%s1207_s29 + $0x120] ss:$4 sm:$0xff]  ;;  %v955_v63 = vld [vmem:[%s1207_s29 + $0x121] ss:$4 sm:$0xff] }
  0x35   : > { %v491_v58 = vadd.f32 %v475_v46, %v440_v45  ;;  %v441_v59 = vmul.f32 %v935_v34, %v1354_v14  ;;  %v476_v60 = vmul.f32 %v951_v35, %v1361_v19  ;;  %v527_v61 = vmul.f32 %v967_v36, %v1370_v25  ;;  %v971_v0 = vld [vmem:[%s1207_s29 + $0x122] ss:$4 sm:$0xff]  ;;  %v940_v3 = vld [vmem:[%s1207_s29 + $0x140] ss:$4 sm:$0xff]  ;;  %v956_v12 = vld [vmem:[%s1207_s29 + $0x141] ss:$4 sm:$0xff] }
  0x36   : > { %978 = vst [vmem:[%s1252_s4 + $0x1] ss:$4 sm:$0xff] %v538_v51  ;;  %v541_v1 = vadd.f32 %v525_v44, %v490_v54  ;;  %v442_v2 = vmul.f32 %v936_v41, %v1354_v14  ;;  %v477_v4 = vmul.f32 %v952_v42, %v1361_v19  ;;  %v528_v5 = vmul.f32 %v968_v43, %v1370_v25  ;;  %v972_v10 = vld [vmem:[%s1207_s29 + $0x142] ss:$4 sm:$0xff]  ;;  %v941_v18 = vld [vmem:[%s1207_s29 + $0x160] ss:$4 sm:$0xff] }
  0x37   : > { %979 = vst [vmem:[%s1252_s4 + $0x21] ss:$4 sm:$0xff] %v539_v52  ;;  %v542_v6 = vadd.f32 %v526_v47, %v491_v58  ;;  %v492_v7 = vadd.f32 %v476_v60, %v441_v59  ;;  %v443_v8 = vmul.f32 %v937_v48, %v1354_v14  ;;  %v478_v9 = vmul.f32 %v953_v49, %v1361_v19  ;;  %v957_v17 = vld [vmem:[%s1207_s29 + $0x161] ss:$4 sm:$0xff]  ;;  %v973_v20 = vld [vmem:[%s1207_s29 + $0x162] ss:$4 sm:$0xff] }
  0x38   : > { %980 = vst [vmem:[%s1252_s4 + $0x41] ss:$4 sm:$0xff] %v540_v53  ;;  %v493_v11 = vadd.f32 %v477_v4, %v442_v2  ;;  %v529_v13 = vmul.f32 %v969_v50, %v1370_v25  ;;  %v444_v15 = vmul.f32 %v938_v55, %v1354_v14  ;;  %v479_v16 = vmul.f32 %v954_v56, %v1361_v19  ;;  %v942_v26 = vld [vmem:[%s1207_s29 + $0x180] ss:$4 sm:$0xff]  ;;  %v958_v27 = vld [vmem:[%s1207_s29 + $0x181] ss:$4 sm:$0xff] }
  0x39   : > { %981 = vst [vmem:[%s1252_s4 + $0x61] ss:$4 sm:$0xff] %v541_v1  ;;  %v543_v21 = vadd.f32 %v527_v61, %v492_v7  ;;  %v494_v22 = vadd.f32 %v478_v9, %v443_v8  ;;  %v530_v23 = vmul.f32 %v970_v57, %v1370_v25  ;;  %v445_v24 = vmul.f32 %v939_v62, %v1354_v14  ;;  %v974_v32 = vld [vmem:[%s1207_s29 + $0x182] ss:$4 sm:$0xff]  ;;  %v943_v33 = vld [vmem:[%s1207_s29 + $0x1a0] ss:$4 sm:$0xff] }
  0x3a   : > { %982 = vst [vmem:[%s1252_s4 + $0x81] ss:$4 sm:$0xff] %v542_v6  ;;  %v544_v28 = vadd.f32 %v528_v5, %v493_v11  ;;  %v495_v29 = vadd.f32 %v479_v16, %v444_v15  ;;  %v480_v30 = vmul.f32 %v955_v63, %v1361_v19  ;;  %v531_v31 = vmul.f32 %v971_v0, %v1370_v25  ;;  %v959_v38 = vld [vmem:[%s1207_s29 + $0x1a1] ss:$4 sm:$0xff]  ;;  %v975_v39 = vld [vmem:[%s1207_s29 + $0x1a2] ss:$4 sm:$0xff] }
  0x3b   : > { %983 = vst [vmem:[%s1252_s4 + $0xa1] ss:$4 sm:$0xff] %v543_v21  ;;  %v545_v34 = vadd.f32 %v529_v13, %v494_v22  ;;  %v446_v35 = vmul.f32 %v940_v3, %v1354_v14  ;;  %v481_v36 = vmul.f32 %v956_v12, %v1361_v19  ;;  %v532_v37 = vmul.f32 %v972_v10, %v1370_v25  ;;  %v944_v44 = vld [vmem:[%s1207_s29 + $0x1c0] ss:$4 sm:$0xff]  ;;  %v960_v45 = vld [vmem:[%s1207_s29 + $0x1c1] ss:$4 sm:$0xff] }
  0x3c   : > { %984 = vst [vmem:[%s1252_s4 + $0xc1] ss:$4 sm:$0xff] %v544_v28  ;;  %v546_v40 = vadd.f32 %v530_v23, %v495_v29  ;;  %v496_v41 = vadd.f32 %v480_v30, %v445_v24  ;;  %v447_v42 = vmul.f32 %v941_v18, %v1354_v14  ;;  %v482_v43 = vmul.f32 %v957_v17, %v1361_v19  ;;  %v976_v50 = vld [vmem:[%s1207_s29 + $0x1c2] ss:$4 sm:$0xff]  ;;  %v945_v51 = vld [vmem:[%s1207_s29 + $0x1e0] ss:$4 sm:$0xff] }
  0x3d   : > { %985 = vst [vmem:[%s1252_s4 + $0xe1] ss:$4 sm:$0xff] %v545_v34  ;;  %v497_v46 = vadd.f32 %v481_v36, %v446_v35  ;;  %v533_v47 = vmul.f32 %v973_v20, %v1370_v25  ;;  %v448_v48 = vmul.f32 %v942_v26, %v1354_v14  ;;  %v483_v49 = vmul.f32 %v958_v27, %v1361_v19  ;;  %v961_v56 = vld [vmem:[%s1207_s29 + $0x1e1] ss:$4 sm:$0xff]  ;;  %s1453_s15 = sld [smem:[#allocation2 + %s586_s14]]  ;;  %s621_s16 = sadd.s32 2, %s1192_s22 }
  0x3e   : > { %986 = vst [vmem:[%s1252_s4 + $0x101] ss:$4 sm:$0xff] %v546_v40  ;;  %v547_v52 = vadd.f32 %v531_v31, %v496_v41  ;;  %v498_v53 = vadd.f32 %v482_v43, %v447_v42  ;;  %v534_v54 = vmul.f32 %v974_v32, %v1370_v25  ;;  %v449_v55 = vmul.f32 %v943_v33, %v1354_v14  ;;  %v977_v61 = vld [vmem:[%s1207_s29 + $0x1e2] ss:$4 sm:$0xff]  ;;  %s1459_s17 = sld [smem:[#allocation2 + %s621_s16]]  ;;  %s672_s18 = sadd.s32 2, %s1198_s24 }
  0x3f   : > { %v548_v57 = vadd.f32 %v532_v37, %v497_v46  ;;  %v499_v58 = vadd.f32 %v483_v49, %v448_v48  ;;  %v484_v59 = vmul.f32 %v959_v38, %v1361_v19  ;;  %v535_v60 = vmul.f32 %v975_v39, %v1370_v25  ;;  %s1466_s19 = sld [smem:[#allocation2 + %s672_s18]]  ;;  %v588_v12 = vld [vmem:[%s1207_s29] ss:$4 sm:$0xff]  ;;  %v1009_v6 = vld [vmem:[%s1207_s29 + $0x1] ss:$4 sm:$0xff] }
  0x40   : > { %987 = vst [vmem:[%s1252_s4 + $0x121] ss:$4 sm:$0xff] %v547_v52  ;;  %v549_v62 = vadd.f32 %v533_v47, %v498_v53  ;;  %v450_v63 = vmul.f32 %v944_v44, %v1354_v14  ;;  %v485_v0 = vmul.f32 %v960_v45, %v1361_v19  ;;  %v536_v1 = vmul.f32 %v976_v50, %v1370_v25  ;;  %v1025_v9 = vld [vmem:[%s1207_s29 + $0x2] ss:$4 sm:$0xff]  ;;  %v994_v10 = vld [vmem:[%s1207_s29 + $0x20] ss:$4 sm:$0xff] }
  0x41   : > { %988 = vst [vmem:[%s1252_s4 + $0x141] ss:$4 sm:$0xff] %v548_v57  ;;  %v550_v2 = vadd.f32 %v534_v54, %v499_v58  ;;  %v500_v4 = vadd.f32 %v484_v59, %v449_v55  ;;  %v451_v5 = vmul.f32 %v945_v51, %v1354_v14  ;;  %v486_v3 = vmul.f32 %v961_v56, %v1361_v19  ;;  %v1010_v18 = vld [vmem:[%s1207_s29 + $0x21] ss:$4 sm:$0xff]  ;;  %v1026_v11 = vld [vmem:[%s1207_s29 + $0x22] ss:$4 sm:$0xff] }
  0x42   : > { %989 = vst [vmem:[%s1252_s4 + $0x161] ss:$4 sm:$0xff] %v549_v62  ;;  %v501_v7 = vadd.f32 %v485_v0, %v450_v63  ;;  %v537_v8 = vmul.f32 %v977_v61, %v1370_v25  ;;  %v995_v13 = vld [vmem:[%s1207_s29 + $0x40] ss:$4 sm:$0xff]  ;;  %v1011_v17 = vld [vmem:[%s1207_s29 + $0x41] ss:$4 sm:$0xff] }
  0x43   : > { %990 = vst [vmem:[%s1252_s4 + $0x181] ss:$4 sm:$0xff] %v550_v2  ;;  %v551_v14 = vadd.f32 %v535_v60, %v500_v4  ;;  %v502_v19 = vadd.f32 %v486_v3, %v451_v5  ;;  %v1482_v16 = vstv %s1453_s15  ;;  %v1027_v25 = vld [vmem:[%s1207_s29 + $0x42] ss:$4 sm:$0xff]  ;;  %v996_v20 = vld [vmem:[%s1207_s29 + $0x60] ss:$4 sm:$0xff] }
  0x44   : > { %v552_v15 = vadd.f32 %v536_v1, %v501_v7  ;;  %v605_v22 = vmul.f32 %v1482_v16, %v588_v12  ;;  %v1490_v23 = vstv %s1459_s17  ;;  %v606_v24 = vmul.f32 %v994_v10, %v1482_v16  ;;  %v1012_v26 = vld [vmem:[%s1207_s29 + $0x61] ss:$4 sm:$0xff]  ;;  %v1028_v27 = vld [vmem:[%s1207_s29 + $0x62] ss:$4 sm:$0xff]  ;;  %v997_v32 = vld [vmem:[%s1207_s29 + $0x80] ss:$4 sm:$0xff] }
  0x45   : > { %991 = vst [vmem:[%s1252_s4 + $0x1a1] ss:$4 sm:$0xff] %v551_v14  ;;  %v553_v21 = vadd.f32 %v537_v8, %v502_v19  ;;  %v640_v28 = vmul.f32 %v1009_v6, %v1490_v23  ;;  %v1498_v29 = vstv %s1466_s19  ;;  %v641_v30 = vmul.f32 %v1010_v18, %v1490_v23  ;;  %v1013_v33 = vld [vmem:[%s1207_s29 + $0x81] ss:$4 sm:$0xff]  ;;  %v1029_v38 = vld [vmem:[%s1207_s29 + $0x82] ss:$4 sm:$0xff] }
  0x46   : > { %992 = vst [vmem:[%s1252_s4 + $0x1c1] ss:$4 sm:$0xff] %v552_v15  ;;  %v607_v31 = vmul.f32 %v995_v13, %v1482_v16  ;;  %v691_v34 = vmul.f32 %v1025_v9, %v1498_v29  ;;  %v692_v35 = vmul.f32 %v1026_v11, %v1498_v29  ;;  %v642_v36 = vmul.f32 %v1011_v17, %v1490_v23  ;;  %v998_v39 = vld [vmem:[%s1207_s29 + $0xa0] ss:$4 sm:$0xff]  ;;  %v1014_v44 = vld [vmem:[%s1207_s29 + $0xa1] ss:$4 sm:$0xff] }
  0x47   : > { %993 = vst [vmem:[%s1252_s4 + $0x1e1] ss:$4 sm:$0xff] %v553_v21  ;;  %v693_v37 = vmul.f32 %v1027_v25, %v1498_v29  ;;  %v656_v40 = vadd.f32 %v640_v28, %v605_v22  ;;  %v657_v41 = vadd.f32 %v641_v30, %v606_v24  ;;  %v608_v42 = vmul.f32 %v996_v20, %v1482_v16  ;;  %v1030_v45 = vld [vmem:[%s1207_s29 + $0xa2] ss:$4 sm:$0xff]  ;;  %v999_v46 = vld [vmem:[%s1207_s29 + $0xc0] ss:$4 sm:$0xff] }
  0x48   : > { %v643_v43 = vmul.f32 %v1012_v26, %v1490_v23  ;;  %v658_v47 = vadd.f32 %v642_v36, %v607_v31  ;;  %v694_v48 = vmul.f32 %v1028_v27, %v1498_v29  ;;  %v609_v49 = vmul.f32 %v997_v32, %v1482_v16  ;;  %v1015_v51 = vld [vmem:[%s1207_s29 + $0xc1] ss:$4 sm:$0xff]  ;;  %v1031_v52 = vld [vmem:[%s1207_s29 + $0xc2] ss:$4 sm:$0xff]  ;;  %v1000_v53 = vld [vmem:[%s1207_s29 + $0xe0] ss:$4 sm:$0xff] }
  0x49   : > { %v644_v50 = vmul.f32 %v1013_v33, %v1490_v23  ;;  %v707_v54 = vadd.f32 %v691_v34, %v656_v40  ;;  %v708_v55 = vadd.f32 %v692_v35, %v657_v41  ;;  %v695_v57 = vmul.f32 %v1029_v38, %v1498_v29  ;;  %v1016_v58 = vld [vmem:[%s1207_s29 + $0xe1] ss:$4 sm:$0xff]  ;;  %v1032_v59 = vld [vmem:[%s1207_s29 + $0xe2] ss:$4 sm:$0xff]  ;;  %v1001_v60 = vld [vmem:[%s1207_s29 + $0x100] ss:$4 sm:$0xff] }
  0x4a   : > { %v659_v56 = vadd.f32 %v643_v43, %v608_v42  ;;  %v709_v61 = vadd.f32 %v693_v37, %v658_v47  ;;  %v610_v63 = vmul.f32 %v998_v39, %v1482_v16  ;;  %v645_v0 = vmul.f32 %v1014_v44, %v1490_v23  ;;  %v1017_v1 = vld [vmem:[%s1207_s29 + $0x101] ss:$4 sm:$0xff]  ;;  %v1033_v2 = vld [vmem:[%s1207_s29 + $0x102] ss:$4 sm:$0xff]  ;;  %v1002_v4 = vld [vmem:[%s1207_s29 + $0x120] ss:$4 sm:$0xff] }
  0x4b   : > { %v660_v62 = vadd.f32 %v644_v50, %v609_v49  ;;  %1041 = vst [vmem:[%s1252_s4 + $0x2] ss:$4 sm:$0xff] %v707_v54  ;;  %v696_v3 = vmul.f32 %v1030_v45, %v1498_v29  ;;  %v611_v12 = vmul.f32 %v999_v46, %v1482_v16  ;;  %v646_v6 = vmul.f32 %v1015_v51, %v1490_v23  ;;  %v1018_v7 = vld [vmem:[%s1207_s29 + $0x121] ss:$4 sm:$0xff]  ;;  %v1034_v8 = vld [vmem:[%s1207_s29 + $0x122] ss:$4 sm:$0xff] }
  0x4c   : > { %v710_v5 = vadd.f32 %v694_v48, %v659_v56  ;;  %1042 = vst [vmem:[%s1252_s4 + $0x22] ss:$4 sm:$0xff] %v708_v55  ;;  %v661_v10 = vadd.f32 %v645_v0, %v610_v63  ;;  %v697_v18 = vmul.f32 %v1031_v52, %v1498_v29  ;;  %v612_v14 = vmul.f32 %v1000_v53, %v1482_v16  ;;  %v1003_v19 = vld [vmem:[%s1207_s29 + $0x140] ss:$4 sm:$0xff]  ;;  %v1019_v11 = vld [vmem:[%s1207_s29 + $0x141] ss:$4 sm:$0xff] }
  0x4d   : > { %v711_v9 = vadd.f32 %v695_v57, %v660_v62  ;;  %1043 = vst [vmem:[%s1252_s4 + $0x42] ss:$4 sm:$0xff] %v709_v61  ;;  %v662_v13 = vadd.f32 %v646_v6, %v611_v12  ;;  %v647_v15 = vmul.f32 %v1016_v58, %v1490_v23  ;;  %v698_v17 = vmul.f32 %v1032_v59, %v1498_v29  ;;  %v1035_v20 = vld [vmem:[%s1207_s29 + $0x142] ss:$4 sm:$0xff]  ;;  %v1004_v21 = vld [vmem:[%s1207_s29 + $0x160] ss:$4 sm:$0xff] }
  0x4e   : > { %v613_v25 = vmul.f32 %v1001_v60, %v1482_v16  ;;  %1044 = vst [vmem:[%s1252_s4 + $0x62] ss:$4 sm:$0xff] %v710_v5  ;;  %v712_v22 = vadd.f32 %v696_v3, %v661_v10  ;;  %v648_v24 = vmul.f32 %v1017_v1, %v1490_v23  ;;  %v699_v26 = vmul.f32 %v1033_v2, %v1498_v29  ;;  %v1020_v28 = vld [vmem:[%s1207_s29 + $0x161] ss:$4 sm:$0xff]  ;;  %v1036_v30 = vld [vmem:[%s1207_s29 + $0x162] ss:$4 sm:$0xff] }
  0x4f   : > { %v614_v27 = vmul.f32 %v1002_v4, %v1482_v16  ;;  %1045 = vst [vmem:[%s1252_s4 + $0x82] ss:$4 sm:$0xff] %v711_v9  ;;  %v713_v31 = vadd.f32 %v697_v18, %v662_v13  ;;  %v663_v32 = vadd.f32 %v647_v15, %v612_v14  ;;  %v649_v33 = vmul.f32 %v1018_v7, %v1490_v23  ;;  %v1005_v35 = vld [vmem:[%s1207_s29 + $0x180] ss:$4 sm:$0xff]  ;;  %v1021_v36 = vld [vmem:[%s1207_s29 + $0x181] ss:$4 sm:$0xff] }
  0x50   : > { %v700_v34 = vmul.f32 %v1034_v8, %v1498_v29  ;;  %1046 = vst [vmem:[%s1252_s4 + $0xa2] ss:$4 sm:$0xff] %v712_v22  ;;  %v664_v37 = vadd.f32 %v648_v24, %v613_v25  ;;  %v615_v38 = vmul.f32 %v1003_v19, %v1482_v16  ;;  %v650_v39 = vmul.f32 %v1019_v11, %v1490_v23  ;;  %v1037_v41 = vld [vmem:[%s1207_s29 + $0x182] ss:$4 sm:$0xff]  ;;  %v1006_v42 = vld [vmem:[%s1207_s29 + $0x1a0] ss:$4 sm:$0xff] }
  0x51   : > { %v701_v40 = vmul.f32 %v1035_v20, %v1498_v29  ;;  %1047 = vst [vmem:[%s1252_s4 + $0xc2] ss:$4 sm:$0xff] %v713_v31  ;;  %v714_v43 = vadd.f32 %v698_v17, %v663_v32  ;;  %v665_v44 = vadd.f32 %v649_v33, %v614_v27  ;;  %v616_v45 = vmul.f32 %v1004_v21, %v1482_v16  ;;  %v1022_v47 = vld [vmem:[%s1207_s29 + $0x1a1] ss:$4 sm:$0xff]  ;;  %v1038_v48 = vld [vmem:[%s1207_s29 + $0x1a2] ss:$4 sm:$0xff] }
  0x52   : > { %v651_v46 = vmul.f32 %v1020_v28, %v1490_v23  ;;  %v715_v49 = vadd.f32 %v699_v26, %v664_v37  ;;  %v666_v50 = vadd.f32 %v650_v39, %v615_v38  ;;  %v702_v51 = vmul.f32 %v1036_v30, %v1498_v29  ;;  %v1007_v53 = vld [vmem:[%s1207_s29 + $0x1c0] ss:$4 sm:$0xff]  ;;  %v1023_v54 = vld [vmem:[%s1207_s29 + $0x1c1] ss:$4 sm:$0xff]  ;;  %v1039_v55 = vld [vmem:[%s1207_s29 + $0x1c2] ss:$4 sm:$0xff] }
  0x53   : > { %v617_v52 = vmul.f32 %v1005_v35, %v1482_v16  ;;  %1048 = vst [vmem:[%s1252_s4 + $0xe2] ss:$4 sm:$0xff] %v714_v43  ;;  %v716_v56 = vadd.f32 %v700_v34, %v665_v44  ;;  %v652_v58 = vmul.f32 %v1021_v36, %v1490_v23  ;;  %v703_v59 = vmul.f32 %v1037_v41, %v1498_v29  ;;  %v1008_v60 = vld [vmem:[%s1207_s29 + $0x1e0] ss:$4 sm:$0xff]  ;;  %v1024_v61 = vld [vmem:[%s1207_s29 + $0x1e1] ss:$4 sm:$0xff] }
  0x54   : > { %v667_v57 = vadd.f32 %v651_v46, %v616_v45  ;;  %1049 = vst [vmem:[%s1252_s4 + $0x102] ss:$4 sm:$0xff] %v715_v49  ;;  %v717_v62 = vadd.f32 %v701_v40, %v666_v50  ;;  %v618_v63 = vmul.f32 %v1006_v42, %v1482_v16  ;;  %v653_v0 = vmul.f32 %v1022_v47, %v1490_v23  ;;  %v1040_v2 = vld [vmem:[%s1207_s29 + $0x1e2] ss:$4 sm:$0xff] }
  0x55   : > { %v704_v1 = vmul.f32 %v1038_v48, %v1498_v29  ;;  %1050 = vst [vmem:[%s1252_s4 + $0x122] ss:$4 sm:$0xff] %v716_v56  ;;  %v668_v5 = vadd.f32 %v652_v58, %v617_v52  ;;  %v619_v3 = vmul.f32 %v1007_v53, %v1482_v16  ;;  %v654_v12 = vmul.f32 %v1023_v54, %v1490_v23 }
  0x56   : > { %v718_v4 = vadd.f32 %v702_v51, %v667_v57  ;;  %1051 = vst [vmem:[%s1252_s4 + $0x142] ss:$4 sm:$0xff] %v717_v62  ;;  %v669_v6 = vadd.f32 %v653_v0, %v618_v63  ;;  %v705_v7 = vmul.f32 %v1039_v55, %v1498_v29  ;;  %v620_v8 = vmul.f32 %v1008_v60, %v1482_v16 }
  0x57   : > { %v655_v9 = vmul.f32 %v1024_v61, %v1490_v23  ;;  %v719_v10 = vadd.f32 %v703_v59, %v668_v5  ;;  %v670_v18 = vadd.f32 %v654_v12, %v619_v3  ;;  %v706_v14 = vmul.f32 %v1040_v2, %v1498_v29 }
  0x58   : > { %1052 = vst [vmem:[%s1252_s4 + $0x162] ss:$4 sm:$0xff] %v718_v4  ;;  %v720_v19 = vadd.f32 %v704_v1, %v669_v6 }
  0x59   : > { %v671_v11 = vadd.f32 %v655_v9, %v620_v8  ;;  %1053 = vst [vmem:[%s1252_s4 + $0x182] ss:$4 sm:$0xff] %v719_v10  ;;  %v721_v13 = vadd.f32 %v705_v7, %v670_v18 }
  0x5a   : > { %1054 = vst [vmem:[%s1252_s4 + $0x1a2] ss:$4 sm:$0xff] %v720_v19 }
  0x5b   : > { %v722_v15 = vadd.f32 %v706_v14, %v671_v11  ;;  %1055 = vst [vmem:[%s1252_s4 + $0x1c2] ss:$4 sm:$0xff] %v721_v13 }
  0x5d   : > { %1056 = vst [vmem:[%s1252_s4 + $0x1e2] ss:$4 sm:$0xff] %v722_v15 }
  0x5e PF: > { %s13_s11 = sadd.s32 1, %s1146_s11   ;;  %s1610_s9 = smov %s1142_s10 }
  0x5f   : > { %p10_p8 = scmp.ge.s32.totalorder %s13_s11, 4   ;;  %s1611_s10 = smov %s1613_s13 }
  0x61   :  { %12 = sbr.rel (!%p10_p8) target bundleno = 2 (0x2), region = 157 }
  0x66   :  { %785 = vsyncpa [#allocation3], 1 }
  0x67   :  { %787 = vsyncpa [#allocation3 + $0x1], 1 }

</bundles_post_ra>
